<compile_context>
chip_gen: v5e
topology: v5e:2x2
jax: 0.10.0
libtpu: 0.0.40
codegen_flags: <defaults>
</compile_context>

<pallas_src>
import math
import functools

import jax
import jax.numpy as jnp
from jax import lax
from jax.experimental import pallas as pl
from jax.experimental.pallas import tpu as pltpu

# ----------------------------- config (small) -------------------------------
VOCAB_SIZE = 64
D_MODEL    = 32
N_HEADS    = 4
D_FF       = 64
N_PROC_BLOCKS = 1          # -> n_layers = N_PROC_BLOCKS + 1 = 2
N_LAYERS   = N_PROC_BLOCKS + 1
MAX_LEN    = 64
BATCH      = 2
SEQ        = 8
LN_EPS     = 1e-5
VEC_PAD    = 128           # lane-padded width for packed vectors / logits


def _layernorm(h, g, b, eps=LN_EPS):
    """One-pass LayerNorm: independent sum / sum-of-squares reductions."""
    n = h.shape[-1]
    inv_n = 1.0 / n
    s1 = jnp.sum(h, axis=-1, keepdims=True)
    s2 = jnp.sum(h * h, axis=-1, keepdims=True)
    mu = s1 * inv_n
    var = s2 * inv_n - mu * mu
    return (h - mu) * lax.rsqrt(var + eps) * g + b


# --------------------------- fused forward kernel ----------------------------
def fused_forward_kernel(ids_ref, emb_ref, pe_ref,
                         wqkv_ref, wo_ref, w1_ref, w2_ref, wout_ref,
                         pvec_ref, fvec_ref, out_ref,
                         *, n_layers, n_heads, batch, seq):
    V, D = emb_ref.shape
    DFF = w1_ref.shape[2]
    BS = batch * seq
    dk = D // n_heads
    HS = n_heads * seq
    scale = 1.0 / math.sqrt(dk)

    # ---- embedding lookup as one-hot matmul (MXU) + positional encoding ----
    ids = ids_ref[...]                                            # (BS, 1) int32
    vocab_iota = lax.broadcasted_iota(jnp.int32, (BS, V), 1)
    one_hot = (vocab_iota == ids).astype(jnp.bfloat16)            # (BS, V)
    x = jnp.dot(one_hot, emb_ref[...],
                preferred_element_type=jnp.float32)               # (BS, D) f32
    x = (x.reshape(batch, seq, D) + pe_ref[:seq, :][None, :, :]).reshape(BS, D)

    # ---- block-diagonal causal mask over the head-packed score matrix ------
    # Rows/cols ordered (head, position); head index = idx >> log2(seq).
    log2_seq = seq.bit_length() - 1
    assert seq == (1 << log2_seq), "seq must be a power of two"
    r = lax.broadcasted_iota(jnp.int32, (HS, HS), 0)
    c = lax.broadcasted_iota(jnp.int32, (HS, HS), 1)
    valid = ((r >> log2_seq) == (c >> log2_seq)) & (c <= r)
    neg_mask = jnp.where(valid, jnp.float32(0.0), jnp.float32(-1e30))[None]   # (1,HS,HS)

    def pack_heads(mat):
        # (BS, dk-per-head slabs along lanes) -> (B, H*S, dk), rows ordered (head, pos).
        # Only lane slices + vreg-aligned sublane reshapes/concat: cheap relayouts.
        slabs = [mat[:, h * dk:(h + 1) * dk].reshape(batch, seq, dk)
                 for h in range(n_heads)]
        return jnp.concatenate(slabs, axis=1)

    def layer_body(li, x):
        pv  = pvec_ref[li]                  # (8, 128) f32 packed per-layer vectors
        bo  = pv[0:1, :D]
        g1  = pv[1:2, :D]
        be1 = pv[2:3, :D]
        b1  = pv[3:4, :DFF]
        b2  = pv[4:5, :D]
        g2  = pv[5:6, :D]
        be2 = pv[6:7, :D]

        # fused QKV projection: (BS, D) @ (D, 3D) -> one MXU push
        qkv = jnp.dot(x.astype(jnp.bfloat16), wqkv_ref[li],
                      preferred_element_type=jnp.float32)         # (BS, 3D) f32

        # pack all heads along the row axis: one einsum / one softmax per stage
        q_all = pack_heads(qkv[:, :D]).astype(jnp.bfloat16)       # (B, H*S, dk)
        k_all = pack_heads(qkv[:, D:2 * D]).astype(jnp.bfloat16)
        v_all = pack_heads(qkv[:, 2 * D:]).astype(jnp.bfloat16)

        s = jnp.einsum('bqd,bkd->bqk', q_all, k_all,
                       preferred_element_type=jnp.float32) * scale
        s = s + neg_mask                                          # (B, H*S, H*S)
        m = jnp.max(s, axis=-1, keepdims=True)
        e = jnp.exp(s - m)
        rcp = pl.reciprocal(jnp.sum(e, axis=-1, keepdims=True), approx=True)
        p = (e * rcp).astype(jnp.bfloat16)
        o = jnp.einsum('bqk,bkd->bqd', p, v_all,
                       preferred_element_type=jnp.float32)        # (B, H*S, dk) f32

        # unpack heads back into the feature (lane) dim: feature index = h*dk + d
        attn = jnp.concatenate(
            [o[:, h * seq:(h + 1) * seq, :].reshape(BS, dk) for h in range(n_heads)],
            axis=-1)                                              # (BS, D)
        attn_out = jnp.dot(attn.astype(jnp.bfloat16), wo_ref[li],
                           preferred_element_type=jnp.float32) + bo

        # residual + LayerNorm 1
        h1 = _layernorm(x + attn_out, g1, be1)

        # FFN: Linear -> ReLU -> Linear
        f = jnp.dot(h1.astype(jnp.bfloat16), w1_ref[li],
                    preferred_element_type=jnp.float32) + b1
        f = jnp.maximum(f, 0.0)
        f = jnp.dot(f.astype(jnp.bfloat16), w2_ref[li],
                    preferred_element_type=jnp.float32) + b2

        # residual + LayerNorm 2
        return _layernorm(h1 + f, g2, be2)

    x = lax.fori_loop(0, n_layers, layer_body, x, unroll=True)

    # ---- final LayerNorm + lane-padded (128-wide) output projection --------
    fv = fvec_ref[...]                                            # (8, 128) f32
    hN = _layernorm(x, fv[0:1, :D], fv[1:2, :D])
    logits = jnp.dot(hN.astype(jnp.bfloat16), wout_ref[...],
                     preferred_element_type=jnp.float32) + fv[2:3, :]
    out_ref[...] = logits.astype(out_ref.dtype)                   # (BS, 128)


# ------------------------------- wrapper --------------------------------------
@jax.jit
def baseline_transformer_forward(input_ids, params):
    B, S = input_ids.shape
    ids = input_ids.reshape(B * S, 1).astype(jnp.int32)
    kernel = functools.partial(fused_forward_kernel,
                               n_layers=N_LAYERS, n_heads=N_HEADS,
                               batch=B, seq=S)
    vmem = pltpu.MemorySpace.VMEM
    logits_padded = pl.pallas_call(
        kernel,
        out_shape=jax.ShapeDtypeStruct((B * S, VEC_PAD), jnp.float32),
        in_specs=[pl.BlockSpec(memory_space=vmem) for _ in range(10)],
        out_specs=pl.BlockSpec(memory_space=vmem),
    )(ids, params['emb'], params['pe'],
      params['wqkv'], params['wo'], params['w1'], params['w2'], params['w_out'],
      params['pvec'], params['fvec'])
    return logits_padded[:, :VOCAB_SIZE].reshape(B, S, VOCAB_SIZE)


# ----------------------------- parameter init --------------------------------
def init_params(key):
    def normal(k, shape):
        return 0.02 * jax.random.normal(k, shape, dtype=jnp.float32)

    keys = jax.random.split(key, 2 + N_LAYERS)
    params = {}
    params['emb'] = normal(keys[0], (VOCAB_SIZE, D_MODEL)).astype(jnp.bfloat16)

    # sinusoidal positional encoding (deterministic)
    pos = jnp.arange(MAX_LEN, dtype=jnp.float32)[:, None]
    div = jnp.exp(jnp.arange(0, D_MODEL, 2, dtype=jnp.float32)
                  * (-math.log(10000.0) / D_MODEL))
    pe = jnp.zeros((MAX_LEN, D_MODEL), jnp.float32)
    pe = pe.at[:, 0::2].set(jnp.sin(pos * div))
    pe = pe.at[:, 1::2].set(jnp.cos(pos * div))
    params['pe'] = pe

    wqkv, wo, w1, w2 = [], [], [], []
    for li in range(N_LAYERS):
        k = jax.random.split(keys[1 + li], 6)
        wq = normal(k[0], (D_MODEL, D_MODEL))
        wk = normal(k[1], (D_MODEL, D_MODEL))
        wv = normal(k[2], (D_MODEL, D_MODEL))
        wqkv.append(jnp.concatenate([wq, wk, wv], axis=1).astype(jnp.bfloat16))
        wo.append(normal(k[3], (D_MODEL, D_MODEL)).astype(jnp.bfloat16))
        w1.append(normal(k[4], (D_MODEL, D_FF)).astype(jnp.bfloat16))
        w2.append(normal(k[5], (D_FF, D_MODEL)).astype(jnp.bfloat16))
    params['wqkv'] = jnp.stack(wqkv)
    params['wo'] = jnp.stack(wo)
    params['w1'] = jnp.stack(w1)
    params['w2'] = jnp.stack(w2)

    # packed per-layer small vectors: (L, 8, 128) f32
    # rows: 0=out_proj bias, 1=ln1_gamma, 2=ln1_beta, 3=ffn_b1, 4=ffn_b2,
    #       5=ln2_gamma, 6=ln2_beta, 7=unused
    pv = jnp.zeros((8, VEC_PAD), jnp.float32)
    pv = pv.at[1, :D_MODEL].set(1.0)      # ln1 gamma
    pv = pv.at[5, :D_MODEL].set(1.0)      # ln2 gamma
    params['pvec'] = jnp.tile(pv[None], (N_LAYERS, 1, 1))

    # packed final vectors: (8, 128) f32
    # rows: 0=final_ln_gamma, 1=final_ln_beta, 2=output bias (lane-padded)
    fv = jnp.zeros((8, VEC_PAD), jnp.float32)
    fv = fv.at[0, :D_MODEL].set(1.0)
    params['fvec'] = fv

    # lane-padded output projection (D, 128); cols >= VOCAB_SIZE are zero
    w_out = jnp.zeros((D_MODEL, VEC_PAD), jnp.float32)
    w_out = w_out.at[:, :VOCAB_SIZE].set(normal(keys[-1], (D_MODEL, VOCAB_SIZE)))
    params['w_out'] = w_out.astype(jnp.bfloat16)
    return params


# --------------------------- pure-JAX reference -------------------------------
def forward_reference(input_ids, params):
    B, S = input_ids.shape
    dk = D_MODEL // N_HEADS
    x = jnp.take(params['emb'].astype(jnp.float32), input_ids, axis=0)
    x = x + params['pe'][:S][None]
    for li in range(N_LAYERS):
        pv = params['pvec'][li]
        bo, g1, be1 = pv[0, :D_MODEL], pv[1, :D_MODEL], pv[2, :D_MODEL]
        b1 = pv[3, :D_FF]
        b2, g2, be2 = pv[4, :D_MODEL], pv[5, :D_MODEL], pv[6, :D_MODEL]

        qkv = x @ params['wqkv'][li].astype(jnp.float32)
        q, k, v = jnp.split(qkv, 3, axis=-1)
        q = q.reshape(B, S, N_HEADS, dk).transpose(0, 2, 1, 3)
        k = k.reshape(B, S, N_HEADS, dk).transpose(0, 2, 1, 3)
        v = v.reshape(B, S, N_HEADS, dk).transpose(0, 2, 1, 3)
        s = jnp.einsum('bhqd,bhkd->bhqk', q, k) / math.sqrt(dk)
        mask = jnp.triu(jnp.ones((S, S), dtype=bool), k=1)
        s = jnp.where(mask[None, None], -jnp.inf, s)
        p = jax.nn.softmax(s, axis=-1)
        o = jnp.einsum('bhqk,bhkd->bhqd', p, v).transpose(0, 2, 1, 3).reshape(B, S, D_MODEL)
        attn_out = o @ params['wo'][li].astype(jnp.float32) + bo
        h = _layernorm(x + attn_out, g1, be1)
        f = jnp.maximum(h @ params['w1'][li].astype(jnp.float32) + b1, 0.0)
        f = f @ params['w2'][li].astype(jnp.float32) + b2
        x = _layernorm(h + f, g2, be2)
    fv = params['fvec']
    h = _layernorm(x, fv[0, :D_MODEL], fv[1, :D_MODEL])
    return (h @ params['w_out'][:, :VOCAB_SIZE].astype(jnp.float32)
            + fv[2, :VOCAB_SIZE])


if __name__ == "__main__":
    key = jax.random.PRNGKey(0)
    pkey, dkey = jax.random.split(key)
    params = init_params(pkey)
    input_ids = jax.random.randint(dkey, (BATCH, SEQ), 0, VOCAB_SIZE,
                                   dtype=jnp.int32)
    logits = baseline_transformer_forward(input_ids, params)
    logits = jax.block_until_ready(logits)
    assert logits.shape == (BATCH, SEQ, VOCAB_SIZE)
    assert bool(jnp.all(jnp.isfinite(logits)))
    ref = forward_reference(input_ids, params)
    err = float(jnp.max(jnp.abs(logits - ref)))
    assert err < 5e-2, f"max abs err {err}"
    print("KERNEL_OK")
</pallas_src>

<mosaic_0001>
module attributes {stable_mosaic.version = 11 : i64} {
  func.func @fused_forward_kernel(%arg0: memref<16x1xi32, #tpu.memory_space<vmem>>, %arg1: memref<64x32xbf16, #tpu.memory_space<vmem>>, %arg2: memref<64x32xf32, #tpu.memory_space<vmem>>, %arg3: memref<2x32x96xbf16, #tpu.memory_space<vmem>>, %arg4: memref<2x32x32xbf16, #tpu.memory_space<vmem>>, %arg5: memref<2x32x64xbf16, #tpu.memory_space<vmem>>, %arg6: memref<2x64x32xbf16, #tpu.memory_space<vmem>>, %arg7: memref<32x128xbf16, #tpu.memory_space<vmem>>, %arg8: memref<2x8x128xf32, #tpu.memory_space<vmem>>, %arg9: memref<8x128xf32, #tpu.memory_space<vmem>>, %arg10: memref<16x128xf32, #tpu.memory_space<vmem>>) attributes {dimension_semantics = [], scalar_prefetch = 0 : i64, scratch_operands = 0 : i64, tpu.core_type = #tpu.core_type<tc>} {
    %c0 = arith.constant 0 : index
    %c0_0 = arith.constant 0 : index
    %0 = vector.load %arg0[%c0, %c0_0] : memref<16x1xi32, #tpu.memory_space<vmem>>, vector<16x1xi32>
    %1 = tpu.iota {dimensions = array<i32: 1>} : vector<16x64xi32>
    %2 = vector.broadcast %0 : vector<16x1xi32> to vector<16x64xi32>
    %3 = arith.cmpi eq, %1, %2 : vector<16x64xi32>
    %4 = arith.extui %3 : vector<16x64xi1> to vector<16x64xi32>
    %5 = arith.sitofp %4 : vector<16x64xi32> to vector<16x64xf32>
    %6 = arith.truncf %5 : vector<16x64xf32> to vector<16x64xbf16>
    %c0_1 = arith.constant 0 : index
    %c0_2 = arith.constant 0 : index
    %7 = vector.load %arg1[%c0_1, %c0_2] : memref<64x32xbf16, #tpu.memory_space<vmem>>, vector<64x32xbf16>
    %cst = arith.constant dense<0.000000e+00> : vector<16x32xf32>
    %8 = tpu.matmul %6, %7, %cst {dimension_numbers = #tpu.dot_dimension_numbers<[1], [0], [0], [1], [0, 0, 1, 1], [], []>} : vector<16x64xbf16>, vector<64x32xbf16>, vector<16x32xf32> -> vector<16x32xf32>
    %9 = vector.shape_cast %8 : vector<16x32xf32> to vector<2x8x32xf32>
    %c0_3 = arith.constant 0 : index
    %c0_4 = arith.constant 0 : index
    %10 = vector.load %arg2[%c0_3, %c0_4] : memref<64x32xf32, #tpu.memory_space<vmem>>, vector<8x32xf32>
    %11 = vector.shape_cast %10 : vector<8x32xf32> to vector<1x8x32xf32>
    %12 = vector.broadcast %11 : vector<1x8x32xf32> to vector<2x8x32xf32>
    %13 = arith.addf %9, %12 : vector<2x8x32xf32>
    %14 = vector.shape_cast %13 : vector<2x8x32xf32> to vector<16x32xf32>
    %15 = tpu.iota {dimensions = array<i32: 0>} : vector<32x32xi32>
    %16 = tpu.iota {dimensions = array<i32: 1>} : vector<32x32xi32>
    %c3_i32 = arith.constant 3 : i32
    %17 = vector.broadcast %c3_i32 : i32 to vector<32x32xi32>
    %18 = arith.shrsi %15, %17 : vector<32x32xi32>
    %c3_i32_5 = arith.constant 3 : i32
    %19 = vector.broadcast %c3_i32_5 : i32 to vector<32x32xi32>
    %20 = arith.shrsi %16, %19 : vector<32x32xi32>
    %21 = arith.cmpi eq, %18, %20 : vector<32x32xi32>
    %22 = arith.cmpi sle, %16, %15 : vector<32x32xi32>
    %23 = arith.andi %21, %22 : vector<32x32xi1>
    %cst_6 = arith.constant 0.000000e+00 : f32
    %cst_7 = arith.constant -1.000000e+30 : f32
    %24 = vector.broadcast %cst_6 : f32 to vector<32x32xf32>
    %25 = vector.broadcast %cst_7 : f32 to vector<32x32xf32>
    %26 = arith.select %23, %24, %25 : vector<32x32xi1>, vector<32x32xf32>
    %27 = vector.shape_cast %26 : vector<32x32xf32> to vector<1x32x32xf32>
    %c0_i32 = arith.constant 0 : i32
    %28 = arith.index_cast %c0_i32 : i32 to index
    %c0_8 = arith.constant 0 : index
    %c0_9 = arith.constant 0 : index
    %29 = vector.load %arg8[%28, %c0_8, %c0_9] : memref<2x8x128xf32, #tpu.memory_space<vmem>>, vector<1x8x128xf32>
    %30 = vector.shape_cast %29 : vector<1x8x128xf32> to vector<8x128xf32>
    %31 = vector.extract_strided_slice %30 {offsets = [0, 0], sizes = [1, 32], strides = [1, 1]} : vector<8x128xf32> to vector<1x32xf32>
    %32 = vector.extract_strided_slice %30 {offsets = [1, 0], sizes = [1, 32], strides = [1, 1]} : vector<8x128xf32> to vector<1x32xf32>
    %33 = vector.extract_strided_slice %30 {offsets = [2, 0], sizes = [1, 32], strides = [1, 1]} : vector<8x128xf32> to vector<1x32xf32>
    %34 = vector.extract_strided_slice %30 {offsets = [3, 0], sizes = [1, 64], strides = [1, 1]} : vector<8x128xf32> to vector<1x64xf32>
    %35 = vector.extract_strided_slice %30 {offsets = [4, 0], sizes = [1, 32], strides = [1, 1]} : vector<8x128xf32> to vector<1x32xf32>
    %36 = vector.extract_strided_slice %30 {offsets = [5, 0], sizes = [1, 32], strides = [1, 1]} : vector<8x128xf32> to vector<1x32xf32>
    %37 = vector.extract_strided_slice %30 {offsets = [6, 0], sizes = [1, 32], strides = [1, 1]} : vector<8x128xf32> to vector<1x32xf32>
    %38 = arith.truncf %14 : vector<16x32xf32> to vector<16x32xbf16>
    %39 = arith.index_cast %c0_i32 : i32 to index
    %c0_10 = arith.constant 0 : index
    %c0_11 = arith.constant 0 : index
    %40 = vector.load %arg3[%39, %c0_10, %c0_11] : memref<2x32x96xbf16, #tpu.memory_space<vmem>>, vector<1x32x96xbf16>
    %41 = vector.shape_cast %40 : vector<1x32x96xbf16> to vector<32x96xbf16>
    %cst_12 = arith.constant dense<0.000000e+00> : vector<16x96xf32>
    %42 = tpu.matmul %38, %41, %cst_12 {dimension_numbers = #tpu.dot_dimension_numbers<[1], [0], [0], [1], [0, 0, 1, 1], [], []>} : vector<16x32xbf16>, vector<32x96xbf16>, vector<16x96xf32> -> vector<16x96xf32>
    %43 = vector.extract_strided_slice %42 {offsets = [0, 0], sizes = [16, 32], strides = [1, 1]} : vector<16x96xf32> to vector<16x32xf32>
    %44 = vector.extract_strided_slice %43 {offsets = [0, 0], sizes = [16, 8], strides = [1, 1]} : vector<16x32xf32> to vector<16x8xf32>
    %45 = vector.shape_cast %44 : vector<16x8xf32> to vector<2x8x8xf32>
    %46 = vector.extract_strided_slice %43 {offsets = [0, 8], sizes = [16, 8], strides = [1, 1]} : vector<16x32xf32> to vector<16x8xf32>
    %47 = vector.shape_cast %46 : vector<16x8xf32> to vector<2x8x8xf32>
    %48 = vector.extract_strided_slice %43 {offsets = [0, 16], sizes = [16, 8], strides = [1, 1]} : vector<16x32xf32> to vector<16x8xf32>
    %49 = vector.shape_cast %48 : vector<16x8xf32> to vector<2x8x8xf32>
    %50 = vector.extract_strided_slice %43 {offsets = [0, 24], sizes = [16, 8], strides = [1, 1]} : vector<16x32xf32> to vector<16x8xf32>
    %51 = vector.shape_cast %50 : vector<16x8xf32> to vector<2x8x8xf32>
    %52 = tpu.concatenate %45, %47, %49, %51 in 1 : vector<2x8x8xf32>, vector<2x8x8xf32>, vector<2x8x8xf32>, vector<2x8x8xf32> -> vector<2x32x8xf32>
    %53 = arith.truncf %52 : vector<2x32x8xf32> to vector<2x32x8xbf16>
    %54 = vector.extract_strided_slice %42 {offsets = [0, 32], sizes = [16, 32], strides = [1, 1]} : vector<16x96xf32> to vector<16x32xf32>
    %55 = vector.extract_strided_slice %54 {offsets = [0, 0], sizes = [16, 8], strides = [1, 1]} : vector<16x32xf32> to vector<16x8xf32>
    %56 = vector.shape_cast %55 : vector<16x8xf32> to vector<2x8x8xf32>
    %57 = vector.extract_strided_slice %54 {offsets = [0, 8], sizes = [16, 8], strides = [1, 1]} : vector<16x32xf32> to vector<16x8xf32>
    %58 = vector.shape_cast %57 : vector<16x8xf32> to vector<2x8x8xf32>
    %59 = vector.extract_strided_slice %54 {offsets = [0, 16], sizes = [16, 8], strides = [1, 1]} : vector<16x32xf32> to vector<16x8xf32>
    %60 = vector.shape_cast %59 : vector<16x8xf32> to vector<2x8x8xf32>
    %61 = vector.extract_strided_slice %54 {offsets = [0, 24], sizes = [16, 8], strides = [1, 1]} : vector<16x32xf32> to vector<16x8xf32>
    %62 = vector.shape_cast %61 : vector<16x8xf32> to vector<2x8x8xf32>
    %63 = tpu.concatenate %56, %58, %60, %62 in 1 : vector<2x8x8xf32>, vector<2x8x8xf32>, vector<2x8x8xf32>, vector<2x8x8xf32> -> vector<2x32x8xf32>
    %64 = arith.truncf %63 : vector<2x32x8xf32> to vector<2x32x8xbf16>
    %65 = vector.extract_strided_slice %42 {offsets = [0, 64], sizes = [16, 32], strides = [1, 1]} : vector<16x96xf32> to vector<16x32xf32>
    %66 = vector.extract_strided_slice %65 {offsets = [0, 0], sizes = [16, 8], strides = [1, 1]} : vector<16x32xf32> to vector<16x8xf32>
    %67 = vector.shape_cast %66 : vector<16x8xf32> to vector<2x8x8xf32>
    %68 = vector.extract_strided_slice %65 {offsets = [0, 8], sizes = [16, 8], strides = [1, 1]} : vector<16x32xf32> to vector<16x8xf32>
    %69 = vector.shape_cast %68 : vector<16x8xf32> to vector<2x8x8xf32>
    %70 = vector.extract_strided_slice %65 {offsets = [0, 16], sizes = [16, 8], strides = [1, 1]} : vector<16x32xf32> to vector<16x8xf32>
    %71 = vector.shape_cast %70 : vector<16x8xf32> to vector<2x8x8xf32>
    %72 = vector.extract_strided_slice %65 {offsets = [0, 24], sizes = [16, 8], strides = [1, 1]} : vector<16x32xf32> to vector<16x8xf32>
    %73 = vector.shape_cast %72 : vector<16x8xf32> to vector<2x8x8xf32>
    %74 = tpu.concatenate %67, %69, %71, %73 in 1 : vector<2x8x8xf32>, vector<2x8x8xf32>, vector<2x8x8xf32>, vector<2x8x8xf32> -> vector<2x32x8xf32>
    %75 = arith.truncf %74 : vector<2x32x8xf32> to vector<2x32x8xbf16>
    "tpu.trace_start"() <{level = 10 : i32, message = "bqd,bkd->bqk"}> : () -> ()
    %cst_13 = arith.constant dense<0.000000e+00> : vector<2x32x32xf32>
    %76 = tpu.matmul %53, %64, %cst_13 {dimension_numbers = #tpu.dot_dimension_numbers<[2], [2], [1], [1], [0, 0, 0, 1, 1, 1], [0], [0]>} : vector<2x32x8xbf16>, vector<2x32x8xbf16>, vector<2x32x32xf32> -> vector<2x32x32xf32>
    "tpu.trace_stop"() : () -> ()
    %cst_14 = arith.constant 0.353553385 : f32
    %77 = vector.broadcast %cst_14 : f32 to vector<2x32x32xf32>
    %78 = arith.mulf %76, %77 : vector<2x32x32xf32>
    %79 = vector.broadcast %27 : vector<1x32x32xf32> to vector<2x32x32xf32>
    %80 = arith.addf %78, %79 : vector<2x32x32xf32>
    %cst_15 = arith.constant dense<0xFF800000> : vector<2x32xf32>
    %81 = vector.multi_reduction <maximumf>, %80, %cst_15 [2] : vector<2x32x32xf32> to vector<2x32xf32>
    %82 = vector.shape_cast %81 : vector<2x32xf32> to vector<2x32x1xf32>
    %83 = vector.broadcast %82 : vector<2x32x1xf32> to vector<2x32x32xf32>
    %84 = arith.subf %80, %83 : vector<2x32x32xf32>
    %85 = math.exp %84 : vector<2x32x32xf32>
    %cst_16 = arith.constant dense<0.000000e+00> : vector<2x32xf32>
    %86 = vector.multi_reduction <add>, %85, %cst_16 [2] : vector<2x32x32xf32> to vector<2x32xf32>
    %87 = vector.shape_cast %86 : vector<2x32xf32> to vector<2x32x1xf32>
    %88 = tpu.reciprocal %87 {approx = true} : vector<2x32x1xf32> -> vector<2x32x1xf32>
    %89 = vector.broadcast %88 : vector<2x32x1xf32> to vector<2x32x32xf32>
    %90 = arith.mulf %85, %89 : vector<2x32x32xf32>
    %91 = arith.truncf %90 : vector<2x32x32xf32> to vector<2x32x32xbf16>
    "tpu.trace_start"() <{level = 10 : i32, message = "bqk,bkd->bqd"}> : () -> ()
    %cst_17 = arith.constant dense<0.000000e+00> : vector<2x32x8xf32>
    %92 = tpu.matmul %91, %75, %cst_17 {dimension_numbers = #tpu.dot_dimension_numbers<[2], [1], [1], [2], [0, 0, 0, 1, 1, 2], [0], [0]>} : vector<2x32x32xbf16>, vector<2x32x8xbf16>, vector<2x32x8xf32> -> vector<2x32x8xf32>
    "tpu.trace_stop"() : () -> ()
    %93 = vector.extract_strided_slice %92 {offsets = [0, 0, 0], sizes = [2, 8, 8], strides = [1, 1, 1]} : vector<2x32x8xf32> to vector<2x8x8xf32>
    %94 = vector.shape_cast %93 : vector<2x8x8xf32> to vector<16x8xf32>
    %95 = vector.extract_strided_slice %92 {offsets = [0, 8, 0], sizes = [2, 8, 8], strides = [1, 1, 1]} : vector<2x32x8xf32> to vector<2x8x8xf32>
    %96 = vector.shape_cast %95 : vector<2x8x8xf32> to vector<16x8xf32>
    %97 = vector.extract_strided_slice %92 {offsets = [0, 16, 0], sizes = [2, 8, 8], strides = [1, 1, 1]} : vector<2x32x8xf32> to vector<2x8x8xf32>
    %98 = vector.shape_cast %97 : vector<2x8x8xf32> to vector<16x8xf32>
    %99 = vector.extract_strided_slice %92 {offsets = [0, 24, 0], sizes = [2, 8, 8], strides = [1, 1, 1]} : vector<2x32x8xf32> to vector<2x8x8xf32>
    %100 = vector.shape_cast %99 : vector<2x8x8xf32> to vector<16x8xf32>
    %101 = tpu.concatenate %94, %96, %98, %100 in 1 : vector<16x8xf32>, vector<16x8xf32>, vector<16x8xf32>, vector<16x8xf32> -> vector<16x32xf32>
    %102 = arith.truncf %101 : vector<16x32xf32> to vector<16x32xbf16>
    %103 = arith.index_cast %c0_i32 : i32 to index
    %c0_18 = arith.constant 0 : index
    %c0_19 = arith.constant 0 : index
    %104 = vector.load %arg4[%103, %c0_18, %c0_19] : memref<2x32x32xbf16, #tpu.memory_space<vmem>>, vector<1x32x32xbf16>
    %105 = vector.shape_cast %104 : vector<1x32x32xbf16> to vector<32x32xbf16>
    %cst_20 = arith.constant dense<0.000000e+00> : vector<16x32xf32>
    %106 = tpu.matmul %102, %105, %cst_20 {dimension_numbers = #tpu.dot_dimension_numbers<[1], [0], [0], [1], [0, 0, 1, 1], [], []>} : vector<16x32xbf16>, vector<32x32xbf16>, vector<16x32xf32> -> vector<16x32xf32>
    %107 = vector.broadcast %31 : vector<1x32xf32> to vector<16x32xf32>
    %108 = arith.addf %106, %107 : vector<16x32xf32>
    %109 = arith.addf %14, %108 : vector<16x32xf32>
    %cst_21 = arith.constant dense<0.000000e+00> : vector<16xf32>
    %110 = vector.multi_reduction <add>, %109, %cst_21 [1] : vector<16x32xf32> to vector<16xf32>
    %111 = vector.shape_cast %110 : vector<16xf32> to vector<16x1xf32>
    %112 = arith.mulf %109, %109 : vector<16x32xf32>
    %cst_22 = arith.constant dense<0.000000e+00> : vector<16xf32>
    %113 = vector.multi_reduction <add>, %112, %cst_22 [1] : vector<16x32xf32> to vector<16xf32>
    %114 = vector.shape_cast %113 : vector<16xf32> to vector<16x1xf32>
    %cst_23 = arith.constant 3.125000e-02 : f32
    %115 = vector.broadcast %cst_23 : f32 to vector<16x1xf32>
    %116 = arith.mulf %111, %115 : vector<16x1xf32>
    %cst_24 = arith.constant 3.125000e-02 : f32
    %117 = vector.broadcast %cst_24 : f32 to vector<16x1xf32>
    %118 = arith.mulf %114, %117 : vector<16x1xf32>
    %119 = arith.mulf %116, %116 : vector<16x1xf32>
    %120 = arith.subf %118, %119 : vector<16x1xf32>
    %121 = vector.broadcast %116 : vector<16x1xf32> to vector<16x32xf32>
    %122 = arith.subf %109, %121 : vector<16x32xf32>
    %cst_25 = arith.constant 9.99999974E-6 : f32
    %123 = vector.broadcast %cst_25 : f32 to vector<16x1xf32>
    %124 = arith.addf %120, %123 : vector<16x1xf32>
    %125 = math.rsqrt %124 : vector<16x1xf32>
    %126 = vector.broadcast %125 : vector<16x1xf32> to vector<16x32xf32>
    %127 = arith.mulf %122, %126 : vector<16x32xf32>
    %128 = vector.broadcast %32 : vector<1x32xf32> to vector<16x32xf32>
    %129 = arith.mulf %127, %128 : vector<16x32xf32>
    %130 = vector.broadcast %33 : vector<1x32xf32> to vector<16x32xf32>
    %131 = arith.addf %129, %130 : vector<16x32xf32>
    %132 = arith.truncf %131 : vector<16x32xf32> to vector<16x32xbf16>
    %133 = arith.index_cast %c0_i32 : i32 to index
    %c0_26 = arith.constant 0 : index
    %c0_27 = arith.constant 0 : index
    %134 = vector.load %arg5[%133, %c0_26, %c0_27] : memref<2x32x64xbf16, #tpu.memory_space<vmem>>, vector<1x32x64xbf16>
    %135 = vector.shape_cast %134 : vector<1x32x64xbf16> to vector<32x64xbf16>
    %cst_28 = arith.constant dense<0.000000e+00> : vector<16x64xf32>
    %136 = tpu.matmul %132, %135, %cst_28 {dimension_numbers = #tpu.dot_dimension_numbers<[1], [0], [0], [1], [0, 0, 1, 1], [], []>} : vector<16x32xbf16>, vector<32x64xbf16>, vector<16x64xf32> -> vector<16x64xf32>
    %137 = vector.broadcast %34 : vector<1x64xf32> to vector<16x64xf32>
    %138 = arith.addf %136, %137 : vector<16x64xf32>
    %cst_29 = arith.constant 0.000000e+00 : f32
    %139 = vector.broadcast %cst_29 : f32 to vector<16x64xf32>
    %140 = arith.maximumf %138, %139 : vector<16x64xf32>
    %141 = arith.truncf %140 : vector<16x64xf32> to vector<16x64xbf16>
    %142 = arith.index_cast %c0_i32 : i32 to index
    %c0_30 = arith.constant 0 : index
    %c0_31 = arith.constant 0 : index
    %143 = vector.load %arg6[%142, %c0_30, %c0_31] : memref<2x64x32xbf16, #tpu.memory_space<vmem>>, vector<1x64x32xbf16>
    %144 = vector.shape_cast %143 : vector<1x64x32xbf16> to vector<64x32xbf16>
    %cst_32 = arith.constant dense<0.000000e+00> : vector<16x32xf32>
    %145 = tpu.matmul %141, %144, %cst_32 {dimension_numbers = #tpu.dot_dimension_numbers<[1], [0], [0], [1], [0, 0, 1, 1], [], []>} : vector<16x64xbf16>, vector<64x32xbf16>, vector<16x32xf32> -> vector<16x32xf32>
    %146 = vector.broadcast %35 : vector<1x32xf32> to vector<16x32xf32>
    %147 = arith.addf %145, %146 : vector<16x32xf32>
    %148 = arith.addf %131, %147 : vector<16x32xf32>
    %cst_33 = arith.constant dense<0.000000e+00> : vector<16xf32>
    %149 = vector.multi_reduction <add>, %148, %cst_33 [1] : vector<16x32xf32> to vector<16xf32>
    %150 = vector.shape_cast %149 : vector<16xf32> to vector<16x1xf32>
    %151 = arith.mulf %148, %148 : vector<16x32xf32>
    %cst_34 = arith.constant dense<0.000000e+00> : vector<16xf32>
    %152 = vector.multi_reduction <add>, %151, %cst_34 [1] : vector<16x32xf32> to vector<16xf32>
    %153 = vector.shape_cast %152 : vector<16xf32> to vector<16x1xf32>
    %cst_35 = arith.constant 3.125000e-02 : f32
    %154 = vector.broadcast %cst_35 : f32 to vector<16x1xf32>
    %155 = arith.mulf %150, %154 : vector<16x1xf32>
    %cst_36 = arith.constant 3.125000e-02 : f32
    %156 = vector.broadcast %cst_36 : f32 to vector<16x1xf32>
    %157 = arith.mulf %153, %156 : vector<16x1xf32>
    %158 = arith.mulf %155, %155 : vector<16x1xf32>
    %159 = arith.subf %157, %158 : vector<16x1xf32>
    %160 = vector.broadcast %155 : vector<16x1xf32> to vector<16x32xf32>
    %161 = arith.subf %148, %160 : vector<16x32xf32>
    %cst_37 = arith.constant 9.99999974E-6 : f32
    %162 = vector.broadcast %cst_37 : f32 to vector<16x1xf32>
    %163 = arith.addf %159, %162 : vector<16x1xf32>
    %164 = math.rsqrt %163 : vector<16x1xf32>
    %165 = vector.broadcast %164 : vector<16x1xf32> to vector<16x32xf32>
    %166 = arith.mulf %161, %165 : vector<16x32xf32>
    %167 = vector.broadcast %36 : vector<1x32xf32> to vector<16x32xf32>
    %168 = arith.mulf %166, %167 : vector<16x32xf32>
    %169 = vector.broadcast %37 : vector<1x32xf32> to vector<16x32xf32>
    %170 = arith.addf %168, %169 : vector<16x32xf32>
    %c1_i32 = arith.constant 1 : i32
    %171 = arith.index_cast %c1_i32 : i32 to index
    %c0_38 = arith.constant 0 : index
    %c0_39 = arith.constant 0 : index
    %172 = vector.load %arg8[%171, %c0_38, %c0_39] : memref<2x8x128xf32, #tpu.memory_space<vmem>>, vector<1x8x128xf32>
    %173 = vector.shape_cast %172 : vector<1x8x128xf32> to vector<8x128xf32>
    %174 = vector.extract_strided_slice %173 {offsets = [0, 0], sizes = [1, 32], strides = [1, 1]} : vector<8x128xf32> to vector<1x32xf32>
    %175 = vector.extract_strided_slice %173 {offsets = [1, 0], sizes = [1, 32], strides = [1, 1]} : vector<8x128xf32> to vector<1x32xf32>
    %176 = vector.extract_strided_slice %173 {offsets = [2, 0], sizes = [1, 32], strides = [1, 1]} : vector<8x128xf32> to vector<1x32xf32>
    %177 = vector.extract_strided_slice %173 {offsets = [3, 0], sizes = [1, 64], strides = [1, 1]} : vector<8x128xf32> to vector<1x64xf32>
    %178 = vector.extract_strided_slice %173 {offsets = [4, 0], sizes = [1, 32], strides = [1, 1]} : vector<8x128xf32> to vector<1x32xf32>
    %179 = vector.extract_strided_slice %173 {offsets = [5, 0], sizes = [1, 32], strides = [1, 1]} : vector<8x128xf32> to vector<1x32xf32>
    %180 = vector.extract_strided_slice %173 {offsets = [6, 0], sizes = [1, 32], strides = [1, 1]} : vector<8x128xf32> to vector<1x32xf32>
    %181 = arith.truncf %170 : vector<16x32xf32> to vector<16x32xbf16>
    %182 = arith.index_cast %c1_i32 : i32 to index
    %c0_40 = arith.constant 0 : index
    %c0_41 = arith.constant 0 : index
    %183 = vector.load %arg3[%182, %c0_40, %c0_41] : memref<2x32x96xbf16, #tpu.memory_space<vmem>>, vector<1x32x96xbf16>
    %184 = vector.shape_cast %183 : vector<1x32x96xbf16> to vector<32x96xbf16>
    %cst_42 = arith.constant dense<0.000000e+00> : vector<16x96xf32>
    %185 = tpu.matmul %181, %184, %cst_42 {dimension_numbers = #tpu.dot_dimension_numbers<[1], [0], [0], [1], [0, 0, 1, 1], [], []>} : vector<16x32xbf16>, vector<32x96xbf16>, vector<16x96xf32> -> vector<16x96xf32>
    %186 = vector.extract_strided_slice %185 {offsets = [0, 0], sizes = [16, 32], strides = [1, 1]} : vector<16x96xf32> to vector<16x32xf32>
    %187 = vector.extract_strided_slice %186 {offsets = [0, 0], sizes = [16, 8], strides = [1, 1]} : vector<16x32xf32> to vector<16x8xf32>
    %188 = vector.shape_cast %187 : vector<16x8xf32> to vector<2x8x8xf32>
    %189 = vector.extract_strided_slice %186 {offsets = [0, 8], sizes = [16, 8], strides = [1, 1]} : vector<16x32xf32> to vector<16x8xf32>
    %190 = vector.shape_cast %189 : vector<16x8xf32> to vector<2x8x8xf32>
    %191 = vector.extract_strided_slice %186 {offsets = [0, 16], sizes = [16, 8], strides = [1, 1]} : vector<16x32xf32> to vector<16x8xf32>
    %192 = vector.shape_cast %191 : vector<16x8xf32> to vector<2x8x8xf32>
    %193 = vector.extract_strided_slice %186 {offsets = [0, 24], sizes = [16, 8], strides = [1, 1]} : vector<16x32xf32> to vector<16x8xf32>
    %194 = vector.shape_cast %193 : vector<16x8xf32> to vector<2x8x8xf32>
    %195 = tpu.concatenate %188, %190, %192, %194 in 1 : vector<2x8x8xf32>, vector<2x8x8xf32>, vector<2x8x8xf32>, vector<2x8x8xf32> -> vector<2x32x8xf32>
    %196 = arith.truncf %195 : vector<2x32x8xf32> to vector<2x32x8xbf16>
    %197 = vector.extract_strided_slice %185 {offsets = [0, 32], sizes = [16, 32], strides = [1, 1]} : vector<16x96xf32> to vector<16x32xf32>
    %198 = vector.extract_strided_slice %197 {offsets = [0, 0], sizes = [16, 8], strides = [1, 1]} : vector<16x32xf32> to vector<16x8xf32>
    %199 = vector.shape_cast %198 : vector<16x8xf32> to vector<2x8x8xf32>
    %200 = vector.extract_strided_slice %197 {offsets = [0, 8], sizes = [16, 8], strides = [1, 1]} : vector<16x32xf32> to vector<16x8xf32>
    %201 = vector.shape_cast %200 : vector<16x8xf32> to vector<2x8x8xf32>
    %202 = vector.extract_strided_slice %197 {offsets = [0, 16], sizes = [16, 8], strides = [1, 1]} : vector<16x32xf32> to vector<16x8xf32>
    %203 = vector.shape_cast %202 : vector<16x8xf32> to vector<2x8x8xf32>
    %204 = vector.extract_strided_slice %197 {offsets = [0, 24], sizes = [16, 8], strides = [1, 1]} : vector<16x32xf32> to vector<16x8xf32>
    %205 = vector.shape_cast %204 : vector<16x8xf32> to vector<2x8x8xf32>
    %206 = tpu.concatenate %199, %201, %203, %205 in 1 : vector<2x8x8xf32>, vector<2x8x8xf32>, vector<2x8x8xf32>, vector<2x8x8xf32> -> vector<2x32x8xf32>
    %207 = arith.truncf %206 : vector<2x32x8xf32> to vector<2x32x8xbf16>
    %208 = vector.extract_strided_slice %185 {offsets = [0, 64], sizes = [16, 32], strides = [1, 1]} : vector<16x96xf32> to vector<16x32xf32>
    %209 = vector.extract_strided_slice %208 {offsets = [0, 0], sizes = [16, 8], strides = [1, 1]} : vector<16x32xf32> to vector<16x8xf32>
    %210 = vector.shape_cast %209 : vector<16x8xf32> to vector<2x8x8xf32>
    %211 = vector.extract_strided_slice %208 {offsets = [0, 8], sizes = [16, 8], strides = [1, 1]} : vector<16x32xf32> to vector<16x8xf32>
    %212 = vector.shape_cast %211 : vector<16x8xf32> to vector<2x8x8xf32>
    %213 = vector.extract_strided_slice %208 {offsets = [0, 16], sizes = [16, 8], strides = [1, 1]} : vector<16x32xf32> to vector<16x8xf32>
    %214 = vector.shape_cast %213 : vector<16x8xf32> to vector<2x8x8xf32>
    %215 = vector.extract_strided_slice %208 {offsets = [0, 24], sizes = [16, 8], strides = [1, 1]} : vector<16x32xf32> to vector<16x8xf32>
    %216 = vector.shape_cast %215 : vector<16x8xf32> to vector<2x8x8xf32>
    %217 = tpu.concatenate %210, %212, %214, %216 in 1 : vector<2x8x8xf32>, vector<2x8x8xf32>, vector<2x8x8xf32>, vector<2x8x8xf32> -> vector<2x32x8xf32>
    %218 = arith.truncf %217 : vector<2x32x8xf32> to vector<2x32x8xbf16>
    "tpu.trace_start"() <{level = 10 : i32, message = "bqd,bkd->bqk"}> : () -> ()
    %cst_43 = arith.constant dense<0.000000e+00> : vector<2x32x32xf32>
    %219 = tpu.matmul %196, %207, %cst_43 {dimension_numbers = #tpu.dot_dimension_numbers<[2], [2], [1], [1], [0, 0, 0, 1, 1, 1], [0], [0]>} : vector<2x32x8xbf16>, vector<2x32x8xbf16>, vector<2x32x32xf32> -> vector<2x32x32xf32>
    "tpu.trace_stop"() : () -> ()
    %cst_44 = arith.constant 0.353553385 : f32
    %220 = vector.broadcast %cst_44 : f32 to vector<2x32x32xf32>
    %221 = arith.mulf %219, %220 : vector<2x32x32xf32>
    %222 = vector.broadcast %27 : vector<1x32x32xf32> to vector<2x32x32xf32>
    %223 = arith.addf %221, %222 : vector<2x32x32xf32>
    %cst_45 = arith.constant dense<0xFF800000> : vector<2x32xf32>
    %224 = vector.multi_reduction <maximumf>, %223, %cst_45 [2] : vector<2x32x32xf32> to vector<2x32xf32>
    %225 = vector.shape_cast %224 : vector<2x32xf32> to vector<2x32x1xf32>
    %226 = vector.broadcast %225 : vector<2x32x1xf32> to vector<2x32x32xf32>
    %227 = arith.subf %223, %226 : vector<2x32x32xf32>
    %228 = math.exp %227 : vector<2x32x32xf32>
    %cst_46 = arith.constant dense<0.000000e+00> : vector<2x32xf32>
    %229 = vector.multi_reduction <add>, %228, %cst_46 [2] : vector<2x32x32xf32> to vector<2x32xf32>
    %230 = vector.shape_cast %229 : vector<2x32xf32> to vector<2x32x1xf32>
    %231 = tpu.reciprocal %230 {approx = true} : vector<2x32x1xf32> -> vector<2x32x1xf32>
    %232 = vector.broadcast %231 : vector<2x32x1xf32> to vector<2x32x32xf32>
    %233 = arith.mulf %228, %232 : vector<2x32x32xf32>
    %234 = arith.truncf %233 : vector<2x32x32xf32> to vector<2x32x32xbf16>
    "tpu.trace_start"() <{level = 10 : i32, message = "bqk,bkd->bqd"}> : () -> ()
    %cst_47 = arith.constant dense<0.000000e+00> : vector<2x32x8xf32>
    %235 = tpu.matmul %234, %218, %cst_47 {dimension_numbers = #tpu.dot_dimension_numbers<[2], [1], [1], [2], [0, 0, 0, 1, 1, 2], [0], [0]>} : vector<2x32x32xbf16>, vector<2x32x8xbf16>, vector<2x32x8xf32> -> vector<2x32x8xf32>
    "tpu.trace_stop"() : () -> ()
    %236 = vector.extract_strided_slice %235 {offsets = [0, 0, 0], sizes = [2, 8, 8], strides = [1, 1, 1]} : vector<2x32x8xf32> to vector<2x8x8xf32>
    %237 = vector.shape_cast %236 : vector<2x8x8xf32> to vector<16x8xf32>
    %238 = vector.extract_strided_slice %235 {offsets = [0, 8, 0], sizes = [2, 8, 8], strides = [1, 1, 1]} : vector<2x32x8xf32> to vector<2x8x8xf32>
    %239 = vector.shape_cast %238 : vector<2x8x8xf32> to vector<16x8xf32>
    %240 = vector.extract_strided_slice %235 {offsets = [0, 16, 0], sizes = [2, 8, 8], strides = [1, 1, 1]} : vector<2x32x8xf32> to vector<2x8x8xf32>
    %241 = vector.shape_cast %240 : vector<2x8x8xf32> to vector<16x8xf32>
    %242 = vector.extract_strided_slice %235 {offsets = [0, 24, 0], sizes = [2, 8, 8], strides = [1, 1, 1]} : vector<2x32x8xf32> to vector<2x8x8xf32>
    %243 = vector.shape_cast %242 : vector<2x8x8xf32> to vector<16x8xf32>
    %244 = tpu.concatenate %237, %239, %241, %243 in 1 : vector<16x8xf32>, vector<16x8xf32>, vector<16x8xf32>, vector<16x8xf32> -> vector<16x32xf32>
    %245 = arith.truncf %244 : vector<16x32xf32> to vector<16x32xbf16>
    %246 = arith.index_cast %c1_i32 : i32 to index
    %c0_48 = arith.constant 0 : index
    %c0_49 = arith.constant 0 : index
    %247 = vector.load %arg4[%246, %c0_48, %c0_49] : memref<2x32x32xbf16, #tpu.memory_space<vmem>>, vector<1x32x32xbf16>
    %248 = vector.shape_cast %247 : vector<1x32x32xbf16> to vector<32x32xbf16>
    %cst_50 = arith.constant dense<0.000000e+00> : vector<16x32xf32>
    %249 = tpu.matmul %245, %248, %cst_50 {dimension_numbers = #tpu.dot_dimension_numbers<[1], [0], [0], [1], [0, 0, 1, 1], [], []>} : vector<16x32xbf16>, vector<32x32xbf16>, vector<16x32xf32> -> vector<16x32xf32>
    %250 = vector.broadcast %174 : vector<1x32xf32> to vector<16x32xf32>
    %251 = arith.addf %249, %250 : vector<16x32xf32>
    %252 = arith.addf %170, %251 : vector<16x32xf32>
    %cst_51 = arith.constant dense<0.000000e+00> : vector<16xf32>
    %253 = vector.multi_reduction <add>, %252, %cst_51 [1] : vector<16x32xf32> to vector<16xf32>
    %254 = vector.shape_cast %253 : vector<16xf32> to vector<16x1xf32>
    %255 = arith.mulf %252, %252 : vector<16x32xf32>
    %cst_52 = arith.constant dense<0.000000e+00> : vector<16xf32>
    %256 = vector.multi_reduction <add>, %255, %cst_52 [1] : vector<16x32xf32> to vector<16xf32>
    %257 = vector.shape_cast %256 : vector<16xf32> to vector<16x1xf32>
    %cst_53 = arith.constant 3.125000e-02 : f32
    %258 = vector.broadcast %cst_53 : f32 to vector<16x1xf32>
    %259 = arith.mulf %254, %258 : vector<16x1xf32>
    %cst_54 = arith.constant 3.125000e-02 : f32
    %260 = vector.broadcast %cst_54 : f32 to vector<16x1xf32>
    %261 = arith.mulf %257, %260 : vector<16x1xf32>
    %262 = arith.mulf %259, %259 : vector<16x1xf32>
    %263 = arith.subf %261, %262 : vector<16x1xf32>
    %264 = vector.broadcast %259 : vector<16x1xf32> to vector<16x32xf32>
    %265 = arith.subf %252, %264 : vector<16x32xf32>
    %cst_55 = arith.constant 9.99999974E-6 : f32
    %266 = vector.broadcast %cst_55 : f32 to vector<16x1xf32>
    %267 = arith.addf %263, %266 : vector<16x1xf32>
    %268 = math.rsqrt %267 : vector<16x1xf32>
    %269 = vector.broadcast %268 : vector<16x1xf32> to vector<16x32xf32>
    %270 = arith.mulf %265, %269 : vector<16x32xf32>
    %271 = vector.broadcast %175 : vector<1x32xf32> to vector<16x32xf32>
    %272 = arith.mulf %270, %271 : vector<16x32xf32>
    %273 = vector.broadcast %176 : vector<1x32xf32> to vector<16x32xf32>
    %274 = arith.addf %272, %273 : vector<16x32xf32>
    %275 = arith.truncf %274 : vector<16x32xf32> to vector<16x32xbf16>
    %276 = arith.index_cast %c1_i32 : i32 to index
    %c0_56 = arith.constant 0 : index
    %c0_57 = arith.constant 0 : index
    %277 = vector.load %arg5[%276, %c0_56, %c0_57] : memref<2x32x64xbf16, #tpu.memory_space<vmem>>, vector<1x32x64xbf16>
    %278 = vector.shape_cast %277 : vector<1x32x64xbf16> to vector<32x64xbf16>
    %cst_58 = arith.constant dense<0.000000e+00> : vector<16x64xf32>
    %279 = tpu.matmul %275, %278, %cst_58 {dimension_numbers = #tpu.dot_dimension_numbers<[1], [0], [0], [1], [0, 0, 1, 1], [], []>} : vector<16x32xbf16>, vector<32x64xbf16>, vector<16x64xf32> -> vector<16x64xf32>
    %280 = vector.broadcast %177 : vector<1x64xf32> to vector<16x64xf32>
    %281 = arith.addf %279, %280 : vector<16x64xf32>
    %cst_59 = arith.constant 0.000000e+00 : f32
    %282 = vector.broadcast %cst_59 : f32 to vector<16x64xf32>
    %283 = arith.maximumf %281, %282 : vector<16x64xf32>
    %284 = arith.truncf %283 : vector<16x64xf32> to vector<16x64xbf16>
    %285 = arith.index_cast %c1_i32 : i32 to index
    %c0_60 = arith.constant 0 : index
    %c0_61 = arith.constant 0 : index
    %286 = vector.load %arg6[%285, %c0_60, %c0_61] : memref<2x64x32xbf16, #tpu.memory_space<vmem>>, vector<1x64x32xbf16>
    %287 = vector.shape_cast %286 : vector<1x64x32xbf16> to vector<64x32xbf16>
    %cst_62 = arith.constant dense<0.000000e+00> : vector<16x32xf32>
    %288 = tpu.matmul %284, %287, %cst_62 {dimension_numbers = #tpu.dot_dimension_numbers<[1], [0], [0], [1], [0, 0, 1, 1], [], []>} : vector<16x64xbf16>, vector<64x32xbf16>, vector<16x32xf32> -> vector<16x32xf32>
    %289 = vector.broadcast %178 : vector<1x32xf32> to vector<16x32xf32>
    %290 = arith.addf %288, %289 : vector<16x32xf32>
    %291 = arith.addf %274, %290 : vector<16x32xf32>
    %cst_63 = arith.constant dense<0.000000e+00> : vector<16xf32>
    %292 = vector.multi_reduction <add>, %291, %cst_63 [1] : vector<16x32xf32> to vector<16xf32>
    %293 = vector.shape_cast %292 : vector<16xf32> to vector<16x1xf32>
    %294 = arith.mulf %291, %291 : vector<16x32xf32>
    %cst_64 = arith.constant dense<0.000000e+00> : vector<16xf32>
    %295 = vector.multi_reduction <add>, %294, %cst_64 [1] : vector<16x32xf32> to vector<16xf32>
    %296 = vector.shape_cast %295 : vector<16xf32> to vector<16x1xf32>
    %cst_65 = arith.constant 3.125000e-02 : f32
    %297 = vector.broadcast %cst_65 : f32 to vector<16x1xf32>
    %298 = arith.mulf %293, %297 : vector<16x1xf32>
    %cst_66 = arith.constant 3.125000e-02 : f32
    %299 = vector.broadcast %cst_66 : f32 to vector<16x1xf32>
    %300 = arith.mulf %296, %299 : vector<16x1xf32>
    %301 = arith.mulf %298, %298 : vector<16x1xf32>
    %302 = arith.subf %300, %301 : vector<16x1xf32>
    %303 = vector.broadcast %298 : vector<16x1xf32> to vector<16x32xf32>
    %304 = arith.subf %291, %303 : vector<16x32xf32>
    %cst_67 = arith.constant 9.99999974E-6 : f32
    %305 = vector.broadcast %cst_67 : f32 to vector<16x1xf32>
    %306 = arith.addf %302, %305 : vector<16x1xf32>
    %307 = math.rsqrt %306 : vector<16x1xf32>
    %308 = vector.broadcast %307 : vector<16x1xf32> to vector<16x32xf32>
    %309 = arith.mulf %304, %308 : vector<16x32xf32>
    %310 = vector.broadcast %179 : vector<1x32xf32> to vector<16x32xf32>
    %311 = arith.mulf %309, %310 : vector<16x32xf32>
    %312 = vector.broadcast %180 : vector<1x32xf32> to vector<16x32xf32>
    %313 = arith.addf %311, %312 : vector<16x32xf32>
    %c2_i32 = arith.constant 2 : i32
    %c0_68 = arith.constant 0 : index
    %c0_69 = arith.constant 0 : index
    %314 = vector.load %arg9[%c0_68, %c0_69] : memref<8x128xf32, #tpu.memory_space<vmem>>, vector<8x128xf32>
    %315 = vector.extract_strided_slice %314 {offsets = [0, 0], sizes = [1, 32], strides = [1, 1]} : vector<8x128xf32> to vector<1x32xf32>
    %316 = vector.extract_strided_slice %314 {offsets = [1, 0], sizes = [1, 32], strides = [1, 1]} : vector<8x128xf32> to vector<1x32xf32>
    %cst_70 = arith.constant dense<0.000000e+00> : vector<16xf32>
    %317 = vector.multi_reduction <add>, %313, %cst_70 [1] : vector<16x32xf32> to vector<16xf32>
    %318 = vector.shape_cast %317 : vector<16xf32> to vector<16x1xf32>
    %319 = arith.mulf %313, %313 : vector<16x32xf32>
    %cst_71 = arith.constant dense<0.000000e+00> : vector<16xf32>
    %320 = vector.multi_reduction <add>, %319, %cst_71 [1] : vector<16x32xf32> to vector<16xf32>
    %321 = vector.shape_cast %320 : vector<16xf32> to vector<16x1xf32>
    %cst_72 = arith.constant 3.125000e-02 : f32
    %322 = vector.broadcast %cst_72 : f32 to vector<16x1xf32>
    %323 = arith.mulf %318, %322 : vector<16x1xf32>
    %cst_73 = arith.constant 3.125000e-02 : f32
    %324 = vector.broadcast %cst_73 : f32 to vector<16x1xf32>
    %325 = arith.mulf %321, %324 : vector<16x1xf32>
    %326 = arith.mulf %323, %323 : vector<16x1xf32>
    %327 = arith.subf %325, %326 : vector<16x1xf32>
    %328 = vector.broadcast %323 : vector<16x1xf32> to vector<16x32xf32>
    %329 = arith.subf %313, %328 : vector<16x32xf32>
    %cst_74 = arith.constant 9.99999974E-6 : f32
    %330 = vector.broadcast %cst_74 : f32 to vector<16x1xf32>
    %331 = arith.addf %327, %330 : vector<16x1xf32>
    %332 = math.rsqrt %331 : vector<16x1xf32>
    %333 = vector.broadcast %332 : vector<16x1xf32> to vector<16x32xf32>
    %334 = arith.mulf %329, %333 : vector<16x32xf32>
    %335 = vector.broadcast %315 : vector<1x32xf32> to vector<16x32xf32>
    %336 = arith.mulf %334, %335 : vector<16x32xf32>
    %337 = vector.broadcast %316 : vector<1x32xf32> to vector<16x32xf32>
    %338 = arith.addf %336, %337 : vector<16x32xf32>
    %339 = arith.truncf %338 : vector<16x32xf32> to vector<16x32xbf16>
    %c0_75 = arith.constant 0 : index
    %c0_76 = arith.constant 0 : index
    %340 = vector.load %arg7[%c0_75, %c0_76] : memref<32x128xbf16, #tpu.memory_space<vmem>>, vector<32x128xbf16>
    %cst_77 = arith.constant dense<0.000000e+00> : vector<16x128xf32>
    %341 = tpu.matmul %339, %340, %cst_77 {dimension_numbers = #tpu.dot_dimension_numbers<[1], [0], [0], [1], [0, 0, 1, 1], [], []>} : vector<16x32xbf16>, vector<32x128xbf16>, vector<16x128xf32> -> vector<16x128xf32>
    %342 = vector.extract_strided_slice %314 {offsets = [2, 0], sizes = [1, 128], strides = [1, 1]} : vector<8x128xf32> to vector<1x128xf32>
    %343 = vector.broadcast %342 : vector<1x128xf32> to vector<16x128xf32>
    %344 = arith.addf %341, %343 : vector<16x128xf32>
    %c0_78 = arith.constant 0 : index
    %c0_79 = arith.constant 0 : index
    %345 = vector.load %arg10[%c0_78, %c0_79] : memref<16x128xf32, #tpu.memory_space<vmem>>, vector<16x128xf32>
    tpu.vector_store %arg10[%c0_78, %c0_79], %344 {strides = array<i32>} : memref<16x128xf32, #tpu.memory_space<vmem>>, vector<16x128xf32>,
    return
  }
}

</mosaic_0001>

<bundles_post_ra>
// kernel: baseline_transformer_forward.1
= control target key start
LH: loop header
LB: loop body
LE: loop exit
PB: predicated region body
PF: predicated region fallthrough
CT: control target
= control target key end

     0   :  { %v1796_v0 = vmov 0   ;;  %v38_v7 = vlaneseq  ;;  %v1797_v11 = vmov 0.0   ;;  %vm85_vm2 = vcmask 523264   ;;  %s1798_s29 = smov 120   ;;  %s1799_s30 = smov 112   ;;  %s2214_s0 = inlined_call_operand.vmem [shape: s32[16,1], index: 0, kind: input, shape index: {}]   ;;  %s2215_s1 = inlined_call_operand.vmem [shape: bf16[64,32], index: 1, kind: input, shape index: {}]   ;;  %s2216_s3 = inlined_call_operand.vmem [shape: bf16[2,32,96], index: 3, kind: input, shape index: {}]   ;;  %s2217_s2 = inlined_call_operand.vmem [shape: f32[64,32], index: 2, kind: input, shape index: {}]   ;;  %s2218_s4 = inlined_call_operand.vmem [shape: bf16[2,32,32], index: 4, kind: input, shape index: {}]   ;;  %s2219_s8 = inlined_call_operand.vmem [shape: f32[2,8,128], index: 8, kind: input, shape index: {}]   ;;  %s2220_s5 = inlined_call_operand.vmem [shape: bf16[2,32,64], index: 5, kind: input, shape index: {}]   ;;  %s2221_s6 = inlined_call_operand.vmem [shape: bf16[2,64,32], index: 6, kind: input, shape index: {}]   ;;  %s2222_s7 = inlined_call_operand.vmem [shape: bf16[32,128], index: 7, kind: input, shape index: {}]   ;;  %s2223_s9 = inlined_call_operand.vmem [shape: f32[8,128], index: 9, kind: input, shape index: {}]   ;;  %s2224_s10 = inlined_call_operand.vmem [shape: f32[16,128], index: 10, kind: output, shape index: {}]  }
   0x1   :  { %1651 = vset.pattern.permute.xlu0 %v1796_v0  ;;  %v36_v1 = vld [vmem:[%s2214_s0] sm:$0xff]  ;;  %v1617_v2 = vld [vmem:[%s2215_s1 + $0x18] sm:$0xff]  ;;  %v37_v3 = vld [vmem:[%s2214_s0 + $0x8] sm:$0xff]  ;;  %vm150_vm3 = vcmask 261120   ;;  %s1801_s11 = smov 96   ;;  %vm210_vm4 = vcmask 64512  }
   0x2   :  { %41 = vperm.xlu0 %1651, %v36_v1   ;;  %93 = vmatpush.bf16.msra.mxu0 %v1617_v2  ;;  %v1616_v4 = vld [vmem:[%s2215_s1 + $0x10] sm:$0xff]  ;;  %v1615_v5 = vld [vmem:[%s2215_s1 + $0x8] sm:$0xff]  ;;  %v1614_v6 = vld [vmem:[%s2215_s1] sm:$0xff]  ;;  %v1881_v9 = vand.u32 127, %v38_v7  ;;  %v107_v63 = vshrl.u32 %v38_v7, 7  ;;  %s1803_s12 = smov 64  }
   0x3   :  { %v1619_v15 = vld [vmem:[%s2216_s3 + $0x8] sm:$0xff]  ;;  %v1618_v16 = vld [vmem:[%s2216_s3] sm:$0xff]  ;;  %s1804_s13 = smov 8   ;;  %s1805_s14 = smov 16  }
   0x4   :  { %160 = vmatpush.bf16.msra.mxu1 %v1619_v15  ;;  %v103_v18 = vld [vmem:[%s2217_s2] sm:$0xff]  ;;  %s1800_s2 = smov 104   ;;  %v111_v0 = vshra.s32 %v107_v63, 3  ;;  %v115_v1 = vshra.s32 %v1881_v9, 3  ;;  %vm120_vm6 = vcmp.le.s32.totalorder %v1881_v9, %v107_v63  ;;  %v108_v2 = vadd.s32 8, %v107_v63  ;;  %s1806_s15 = smov 24  }
   0x6   :  { %94 = vmatpush.bf16.msra.mxu0 %v1616_v4  ;;  %vm116_vm5 = vcmp.eq.s32.totalorder %v111_v0, %v115_v1  ;;  %vm121_vm9 = vcmp.le.s32.totalorder %v1881_v9, %v108_v2 }
   0x7   :  { %vm124_vm7 = vmand %vm116_vm5, %vm120_vm6  ;;  %vm510_vm5 = vcmask 195584  }
   0x8   :  { %161 = vmatpush.bf16.msra.mxu1 %v1618_v16  ;;  %v110_v16 = vadd.s32 24, %v107_v63 }
   0xa   :  { %44 = vperm.xlu0 %1651, %v37_v3   ;;  %95 = vmatpush.bf16.msra.mxu0 %v1615_v5  ;;  %v112_v3 = vshra.s32 %v108_v2, 3  ;;  %v1802_v5 = vmov -1e+30   ;;  %vm123_vm15 = vcmp.le.s32.totalorder %v1881_v9, %v110_v16 }
   0xc   :  { %vm117_vm8 = vcmp.eq.s32.totalorder %v112_v3, %v115_v1 }
   0xd   :  { %vm125_vm10 = vmand %vm117_vm8, %vm121_vm9 }
   0xe   :  { %96 = vmatpush.bf16.msra.mxu0 %v1614_v6  ;;  %v1936_v6 = vsel %vm124_vm7, 0.0, %v1802_v5 }
  0x74   :  { %v42_v8 = vpop.permute.xlu0 %41 }
  0x75   :  { %vm46_vm0 = vcmp.eq.s32.totalorder %v1881_v9, %v42_v8 }
  0x76   :  { %v1461_v12 = vsel %vm46_vm0, 1.0, %v1797_v11 }
  0x7c   :  { %v45_v10 = vpop.permute.xlu0 %44 }
  0x7d   :  { %vm47_vm1 = vcmp.eq.s32.totalorder %v1881_v9, %v45_v10  ;;  %v109_v10 = vadd.s32 16, %v107_v63 }
  0x7e   :  { %v1462_v13 = vsel %vm47_vm1, 1.0, %v1797_v11  ;;  %vm507_vm1 = vcmask 130048  }
  0x7f   :  { %v52_v14 = vpack.c.bf16 %v1462_v13, %v1461_v12  ;;  %v113_v12 = vshra.s32 %v109_v10, 3  ;;  %vm122_vm12 = vcmp.le.s32.totalorder %v1881_v9, %v109_v10 }
  0x81   :  { %1479 = vmatmul.msk.bf16.vlgmr.msra.gmra.mxu0 %vm85_vm2, %v52_v14  ;;  %v1941_v14 = vsel %vm125_vm10, 0.0, %v1802_v5  ;;  %vm118_vm11 = vcmp.eq.s32.totalorder %v113_v12, %v115_v1 }
  0x82   :  { %vm126_vm13 = vmand %vm118_vm11, %vm122_vm12 }
  0xfe   :  { %v98_v17 = vpop.f32.mrf.mxu0 }
  0xff   :  { %v1895_v20 = vadd.f32 %v103_v18, %v98_v17 }
 0x106   :  { %v100_v19 = vpop.f32.mrf.mxu0 }
 0x107   :  { %v1897_v21 = vadd.f32 %v103_v18, %v100_v19  ;;  %v114_v19 = vshra.s32 %v110_v16, 3 }
 0x109   :  { %v133_v22 = vpack.c.bf16 %v1897_v21, %v1895_v20  ;;  %vm119_vm14 = vcmp.eq.s32.totalorder %v114_v19, %v115_v1 }
 0x10a   :  { %vm127_vm0 = vmand %vm119_vm14, %vm123_vm15 }
 0x10b   :  { %1488 = vmatmul.msk.bf16.vlgmr.msra.gmra.mxu1 %vm150_vm3, %v133_v22 }
 0x188   :  { %v163_v23 = vpop.f32.mrf.mxu1 }
 0x189   :  { %v188_v27 = vpack.c.bf16 %v163_v23, %v163_v23 }
 0x18b   :  { %v200_v31 = vunpack.c.l.b16 %v188_v27 }
 0x190   :  { %v165_v24 = vpop.f32.mrf.mxu1 }
 0x191   :  { %v1662_v25 = vpack.i.bf16 %v165_v24, %v163_v23  ;;  %v192_v51 = vpack.c.bf16 %v165_v24, %v165_v24  ;;  %v1946_v23 = vsel %vm126_vm13, 0.0, %v1802_v5 }
 0x193   :  { %1663 = vrot.lane.b32.xlu2 %v1662_v25, %s1798_s29  ;;  %1653 = vrot.lane.b32.xlu1 %v1662_v25, %s1799_s30  ;;  %v246_v53 = vunpack.c.l.b16 %v192_v51 }
 0x19b   :  { %1658 = vrot.lane.b32.xlu1 %v1662_v25, %s1800_s2 }
 0x1ed   :  { %v1664_v26 = vpop.permute.xlu2 %1663 }
 0x1ee   :  { %v1665_v28 = vunpack.i.l.bf16 %v1664_v26  ;;  %v1666_v41 = vunpack.i.h.bf16 %v1664_v26 }
 0x1f0   :  { %v189_v29 = vpack.c.bf16 %v1665_v28, %v1665_v28  ;;  %v193_v48 = vpack.c.bf16 %v1666_v41, %v1666_v41 }
 0x1f2   :  { %v201_v30 = vunpack.c.l.b16 %v189_v29  ;;  %v247_v52 = vunpack.c.l.b16 %v193_v48  ;;  %v1951_v29 = vsel %vm127_vm0, 0.0, %v1802_v5 }
 0x1f4   :  { %v1905_v32 = vpack.c.b16 %v201_v30, %v200_v31  ;;  %v1917_v54 = vpack.c.b16 %v247_v52, %v246_v53 }
 0x1f6   :  { %206 = vrot.lane.b32.xlu1 %v1905_v32, %s1801_s11 }
 0x205   :  { %v1654_v33 = vpop.permute.xlu1 %1653 }
 0x206   :  { %v1656_v34 = vunpack.i.h.bf16 %v1654_v33  ;;  %v1655_v35 = vunpack.i.l.bf16 %v1654_v33 }
 0x208   :  { %v194_v37 = vpack.c.bf16 %v1656_v34, %v1656_v34  ;;  %v190_v38 = vpack.c.bf16 %v1655_v35, %v1655_v35 }
 0x20a   :  { %v248_v44 = vunpack.c.l.b16 %v194_v37  ;;  %v202_v45 = vunpack.c.l.b16 %v190_v38 }
 0x20d   :  { %v1659_v36 = vpop.permute.xlu1 %1658 }
 0x20e   :  { %v1661_v39 = vunpack.i.h.bf16 %v1659_v36  ;;  %v1660_v40 = vunpack.i.l.bf16 %v1659_v36 }
 0x210   :  { %v195_v42 = vpack.c.bf16 %v1661_v39, %v1661_v39  ;;  %v191_v43 = vpack.c.bf16 %v1660_v40, %v1660_v40 }
 0x212   :  { %v249_v46 = vunpack.c.l.b16 %v195_v42  ;;  %v203_v47 = vunpack.c.l.b16 %v191_v43 }
 0x214   :  { %v1909_v49 = vpack.c.b16 %v249_v46, %v248_v44  ;;  %v1911_v50 = vpack.c.b16 %v203_v47, %v202_v45 }
 0x216   :  { %254 = vrot.lane.b32.xlu0 %v1909_v49, %s1801_s11  ;;  %208 = vrot.lane.b32.xlu2 %v1911_v50, %s1801_s11 }
 0x21e   :  { %252 = vrot.lane.b32.xlu2 %v1917_v54, %s1801_s11 }
 0x268   :  { %v207_v57 = vpop.permute.xlu1 %206 }
 0x269   :  { %v218_v58 = vsel %vm210_vm4, %v207_v57, 0 }
 0x270   :  { %v209_v55 = vpop.permute.xlu2 %208 }
 0x271   :  { %v221_v56 = vsel %vm210_vm4, %v209_v55, 0 }
 0x272   :  { %229 = vmatpush.bf16.xpose.msra.mxu2 %v221_v56 }
 0x278   :  { %v253_v61 = vpop.permute.xlu2 %252 }
 0x279   :  { %v263_v62 = vsel %vm210_vm4, %v253_v61, 0 }
 0x27a   :  { %230 = vmatpush.bf16.xpose.msra.mxu2 %v218_v58 }
 0x281   :  { %1489 = vmatmul.msk.bf16.vlgmr.msra.gmra.mxu2 %vm210_vm4, %v1905_v32 }
 0x288   :  { %v255_v59 = vpop.permute.xlu0 %254 }
 0x289   :  { %v266_v60 = vsel %vm210_vm4, %v255_v59, 0 }
 0x28a   :  { %274 = vmatpush.bf16.xpose.msra.mxu3 %v266_v60 }
 0x291   :  { %1490 = vmatmul.msk.bf16.gmra.mxu2 %vm210_vm4, %v1911_v50 }
 0x292   :  { %275 = vmatpush.bf16.xpose.msra.mxu3 %v263_v62 }
 0x299   :  { %1491 = vmatmul.msk.bf16.vlgmr.msra.gmra.mxu3 %vm210_vm4, %v1917_v54 }
 0x2a9   :  { %1492 = vmatmul.msk.bf16.gmra.mxu3 %vm210_vm4, %v1909_v49 }
 0x304   :  { %v232_v4 = vpop.f32.mrf.mxu2 }
 0x305   :  { %v287_v8 = vmul.f32 0.35355338, %v232_v4 }
 0x307   :  { %v295_v7 = vadd.f32 %v287_v8, %v1936_v6 }
 0x309   :  { %v303_v11 = vsel %vm150_vm3, %v295_v7, -inf }
 0x30a   :  { %304 = vmax.xlane.f32.xlu0 %v303_v11 }
 0x30c   :  { %v234_v13 = vpop.f32.mrf.mxu2 }
 0x30d   :  { %v288_v15 = vmul.f32 0.35355338, %v234_v13 }
 0x30f   :  { %v296_v17 = vadd.f32 %v288_v15, %v1941_v14 }
 0x311   :  { %v306_v18 = vsel %vm150_vm3, %v296_v17, -inf }
 0x312   :  { %307 = vmax.xlane.f32.xlu1 %v306_v18 }
 0x314   :  { %v237_v22 = vpop.f32.mrf.mxu2 }
 0x315   :  { %v289_v24 = vmul.f32 0.35355338, %v237_v22 }
 0x317   :  { %v297_v25 = vadd.f32 %v289_v24, %v1946_v23 }
 0x319   :  { %v309_v26 = vsel %vm150_vm3, %v297_v25, -inf }
 0x31a   :  { %310 = vmax.xlane.f32.xlu0 %v309_v26 }
 0x31c   :  { %v239_v27 = vpop.f32.mrf.mxu2  ;;  %v277_v28 = vpop.f32.mrf.mxu3 }
 0x31d   :  { %v290_v30 = vmul.f32 0.35355338, %v239_v27  ;;  %v291_v31 = vmul.f32 0.35355338, %v277_v28 }
 0x31f   :  { %v1954_v33 = vadd.f32 %v290_v30, %v1951_v29  ;;  %v299_v34 = vadd.f32 %v291_v31, %v1936_v6 }
 0x321   :  { %v312_v9 = vsel %vm150_vm3, %v1954_v33, -inf  ;;  %v315_v35 = vsel %vm150_vm3, %v299_v34, -inf }
 0x322   :  { %313 = vmax.xlane.f32.xlu1 %v312_v9  ;;  %316 = vmax.xlane.f32.xlu2 %v315_v35 }
 0x324   :  { %v279_v36 = vpop.f32.mrf.mxu3 }
 0x325   :  { %v292_v37 = vmul.f32 0.35355338, %v279_v36 }
 0x327   :  { %v300_v38 = vadd.f32 %v292_v37, %v1941_v14 }
 0x329   :  { %v318_v39 = vsel %vm150_vm3, %v300_v38, -inf }
 0x32a   :  { %319 = vmax.xlane.f32.xlu2 %v318_v39 }
 0x32c   :  { %v282_v40 = vpop.f32.mrf.mxu3 }
 0x32d   :  { %v293_v41 = vmul.f32 0.35355338, %v282_v40 }
 0x32e   :  { %452 = vrot.lane.b32.xlu0 %v1909_v49, %s1803_s12 }
 0x32f   :  { %v301_v42 = vadd.f32 %v293_v41, %v1946_v23 }
 0x331   :  { %v321_v43 = vsel %vm150_vm3, %v301_v42, -inf }
 0x332   :  { %322 = vmax.xlane.f32.xlu2 %v321_v43 }
 0x334   :  { %v284_v44 = vpop.f32.mrf.mxu3 }
 0x335   :  { %v294_v45 = vmul.f32 0.35355338, %v284_v44 }
 0x337   :  { %v302_v46 = vadd.f32 %v294_v45, %v1951_v29 }
 0x339   :  { %v324_v47 = vsel %vm150_vm3, %v302_v46, -inf }
 0x34a   :  { %411 = vrot.lane.b32.xlu2 %v1911_v50, %s1803_s12 }
 0x358   :  { %325 = vmax.xlane.f32.xlu0 %v324_v47 }
 0x37d   :  { %v305_v48 = vpop.xlane.xlu0 %304 }
 0x37e   :  { %v327_v51 = vsub.f32 %v295_v7, %v305_v48 }
 0x380   :  { %v335_v52 = vmul.f32 1.442695, %v327_v51 }
 0x382   :  { %1712 = vpow2.f32 %v335_v52 }
 0x385   :  { %v308_v49 = vpop.xlane.xlu1 %307 }
 0x386   :  { %v328_v53 = vsub.f32 %v296_v17, %v308_v49 }
 0x388   :  { %v1970_v55 = vpop.eup %1712  ;;  %v337_v56 = vmul.f32 1.442695, %v328_v53 }
 0x389   :  { %v351_v57 = vsel %vm150_vm3, %v1970_v55, 0.0 }
 0x38a   :  { %1714 = vpow2.f32 %v337_v56  ;;  %352 = vadd.xlane.f32.xlu1 %v351_v57 }
 0x38d   :  { %v311_v50 = vpop.xlane.xlu0 %310 }
 0x38e   :  { %v329_v58 = vsub.f32 %v297_v25, %v311_v50 }
 0x390   :  { %v1974_v59 = vpop.eup %1714  ;;  %v339_v60 = vmul.f32 1.442695, %v329_v58 }
 0x391   :  { %v354_v61 = vsel %vm150_vm3, %v1974_v59, 0.0 }
 0x392   :  { %1716 = vpow2.f32 %v339_v60  ;;  %355 = vadd.xlane.f32.xlu2 %v354_v61 }
 0x395   :  { %v317_v62 = vpop.xlane.xlu2 %316  ;;  %v314_v26 = vpop.xlane.xlu1 %313 }
 0x396   :  { %v331_v63 = vsub.f32 %v299_v34, %v317_v62  ;;  %v330_v27 = vsub.f32 %v1954_v33, %v314_v26 }
 0x398   :  { %v1978_v0 = vpop.eup %1716  ;;  %v343_v1 = vmul.f32 1.442695, %v331_v63  ;;  %v341_v30 = vmul.f32 1.442695, %v330_v27 }
 0x399   :  { %v357_v2 = vsel %vm150_vm3, %v1978_v0, 0.0 }
 0x39a   :  { %358 = vadd.xlane.f32.xlu2 %v357_v2  ;;  %1718 = vpow2.f32 %v343_v1 }
 0x39d   :  { %v320_v3 = vpop.xlane.xlu2 %319 }
 0x39e   :  { %v332_v4 = vsub.f32 %v300_v38, %v320_v3 }
 0x3a0   :  { %v345_v5 = vmul.f32 1.442695, %v332_v4  ;;  %v453_v8 = vpop.permute.xlu0 %452  ;;  %v1719_v10 = vpop.eup %1718 }
 0x3a1   :  { %468 = vmatpush.bf16.msrb.mxu0 %v453_v8  ;;  %v363_v7 = vsel %vm150_vm3, %v1719_v10, 0.0 }
 0x3a2   :  { %1720 = vpow2.f32 %v345_v5  ;;  %364 = vadd.xlane.f32.xlu0 %v363_v7 }
 0x3a5   :  { %v323_v11 = vpop.xlane.xlu2 %322 }
 0x3a6   :  { %v333_v19 = vsub.f32 %v301_v42, %v323_v11 }
 0x3a8   :  { %v1721_v12 = vpop.eup %1720  ;;  %v347_v22 = vmul.f32 1.442695, %v333_v19 }
 0x3a9   :  { %v366_v13 = vsel %vm150_vm3, %v1721_v12, 0.0 }
 0x3aa   :  { %367 = vadd.xlane.f32.xlu1 %v366_v13 }
 0x3ad   :  { %v412_v15 = vpop.permute.xlu2 %411 }
 0x3ae   :  { %427 = vmatpush.bf16.msrb.mxu1 %v412_v15 }
 0x3b6   :  { %450 = vrot.lane.b32.xlu0 %v1917_v54, %s1803_s12 }
 0x3c3   :  { %409 = vrot.lane.b32.xlu1 %v1905_v32, %s1803_s12 }
 0x3cb   :  { %v326_v16 = vpop.xlane.xlu0 %325 }
 0x3cc   :  { %v334_v17 = vsub.f32 %v302_v46, %v326_v16 }
 0x3ce   :  { %v349_v18 = vmul.f32 1.442695, %v334_v17 }
 0x3d0   :  { %1722 = vpow2.f32 %v349_v18 }
 0x3d1   :  { %1724 = vpow2.f32 %v347_v22 }
 0x3d2   :  { %1726 = vpow2.f32 %v341_v30 }
 0x3d6   :  { %v1723_v24 = vpop.eup %1722 }
 0x3d7   :  { %v372_v25 = vsel %vm150_vm3, %v1723_v24, 0.0  ;;  %v1725_v28 = vpop.eup %1724 }
 0x3d8   :  { %373 = vadd.xlane.f32.xlu2 %v372_v25  ;;  %v369_v54 = vsel %vm150_vm3, %v1725_v28, 0.0  ;;  %v1727_v32 = vpop.eup %1726 }
 0x3d9   :  { %v360_v31 = vsel %vm150_vm3, %v1727_v32, 0.0 }
 0x3e0   :  { %370 = vadd.xlane.f32.xlu0 %v369_v54 }
 0x3ed   :  { %361 = vadd.xlane.f32.xlu1 %v360_v31  ;;  %v1621_v31 = vld [vmem:[%s2218_s4 + $0x8] sm:$0xff] }
 0x3ee   :  { %540 = vmatpush.bf16.msrb.mxu2 %v1621_v31 }
 0x3fd   :  { %v353_v34 = vpop.xlane.xlu1 %352 }
 0x405   :  { %v356_v37 = vpop.xlane.xlu2 %355 }
 0x40d   :  { %v359_v58 = vpop.xlane.xlu2 %358 }
 0x415   :  { %v365_v9 = vpop.xlane.xlu0 %364 }
 0x416   :  { %1728 = vrcp.f32 %v365_v9 }
 0x41c   :  { %v1729_v36 = vpop.eup %1728 }
 0x41d   :  { %v368_v35 = vpop.xlane.xlu1 %367  ;;  %v387_v38 = vmul.f32 %v1729_v36, %v1719_v10 }
 0x41e   :  { %1730 = vrcp.f32 %v368_v35 }
 0x41f   :  { %1732 = vrcp.f32 %v356_v37  ;;  %v395_v39 = vpack.c.bf16 %v387_v38, %v387_v38 }
 0x420   :  { %1734 = vrcp.f32 %v353_v34  ;;  %v1620_v34 = vld [vmem:[%s2218_s4] sm:$0xff] }
 0x421   :  { %v444_v43 = vunpack.c.l.b16 %v395_v39  ;;  %541 = vmatpush.bf16.msrb.mxu2 %v1620_v34 }
 0x424   :  { %v1731_v33 = vpop.eup %1730 }
 0x425   :  { %v388_v40 = vmul.f32 %v1731_v33, %v1721_v12  ;;  %v1733_v42 = vpop.eup %1732 }
 0x426   :  { %v1735_v46 = vpop.eup %1734  ;;  %v384_v47 = vmul.f32 %v1733_v42, %v1974_v59 }
 0x427   :  { %v396_v41 = vpack.c.bf16 %v388_v40, %v388_v40  ;;  %v383_v51 = vmul.f32 %v1735_v46, %v1970_v55 }
 0x428   :  { %v451_v45 = vpop.permute.xlu0 %450  ;;  %v392_v52 = vpack.c.bf16 %v384_v47, %v384_v47 }
 0x429   :  { %v445_v44 = vunpack.c.l.b16 %v396_v41  ;;  %469 = vmatpush.bf16.msrb.mxu0 %v451_v45  ;;  %v391_v49 = vpack.c.bf16 %v383_v51, %v383_v51  ;;  %v2018_v51 = vld [vmem:[%s2219_s8] sm:$0xff] }
 0x42a   :  { %v404_v53 = vunpack.c.l.b16 %v392_v52  ;;  %v518_v52 = vperm.slane %v2018_v51, 0 }
 0x42b   :  { %v448_v48 = vpack.c.b16 %v445_v44, %v444_v43  ;;  %v403_v56 = vunpack.c.l.b16 %v391_v49 }
 0x42d   :  { %1495 = vmatmul.msk.bf16.vlgmr.msrb.gmra.mxu0 %vm150_vm3, %v448_v48  ;;  %v407_v50 = vpack.c.b16 %v404_v53, %v403_v56 }
 0x435   :  { %v410_v57 = vpop.permute.xlu1 %409 }
 0x436   :  { %428 = vmatpush.bf16.msrb.mxu1 %v410_v57 }
 0x439   :  { %1493 = vmatmul.msk.bf16.vlgmr.msrb.gmra.mxu1 %vm150_vm3, %v407_v50 }
 0x44b   :  { %v374_v60 = vpop.xlane.xlu2 %373 }
 0x44c   :  { %1736 = vrcp.f32 %v374_v60 }
 0x452   :  { %v1737_v62 = vpop.eup %1736 }
 0x453   :  { %v371_v61 = vpop.xlane.xlu0 %370  ;;  %v390_v59 = vmul.f32 %v1737_v62, %v1723_v24 }
 0x454   :  { %1738 = vrcp.f32 %v371_v61 }
 0x455   :  { %1740 = vrcp.f32 %v359_v58  ;;  %v398_v1 = vpack.c.bf16 %v390_v59, %v390_v59 }
 0x457   :  { %v447_v5 = vunpack.c.l.b16 %v398_v1 }
 0x45a   :  { %v1739_v63 = vpop.eup %1738 }
 0x45b   :  { %v389_v55 = vmul.f32 %v1739_v63, %v1725_v28  ;;  %v1741_v8 = vpop.eup %1740 }
 0x45c   :  { %v385_v7 = vmul.f32 %v1741_v8, %v1978_v0 }
 0x45d   :  { %v397_v2 = vpack.c.bf16 %v389_v55, %v389_v55 }
 0x45e   :  { %v393_v13 = vpack.c.bf16 %v385_v7, %v385_v7 }
 0x45f   :  { %v446_v4 = vunpack.c.l.b16 %v397_v2 }
 0x460   :  { %v362_v3 = vpop.xlane.xlu1 %361  ;;  %v405_v16 = vunpack.c.l.b16 %v393_v13 }
 0x461   :  { %1742 = vrcp.f32 %v362_v3  ;;  %v449_v10 = vpack.c.b16 %v447_v5, %v446_v4  ;;  %v1623_v5 = vld [vmem:[%s2220_s5 + $0x8] sm:$0xff] }
 0x462   :  { %631 = vmatpush.bf16.msrb.mxu3 %v1623_v5 }
 0x463   :  { %1496 = vmatmul.msk.bf16.gmra.mxu0 %vm150_vm3, %v449_v10 }
 0x467   :  { %v1743_v11 = vpop.eup %1742 }
 0x468   :  { %v386_v12 = vmul.f32 %v1743_v11, %v1727_v32 }
 0x46a   :  { %v394_v15 = vpack.c.bf16 %v386_v12, %v386_v12 }
 0x46c   :  { %v406_v17 = vunpack.c.l.b16 %v394_v15 }
 0x46e   :  { %v408_v18 = vpack.c.b16 %v406_v17, %v405_v16  ;;  %v1627_v16 = vld [vmem:[%s2221_s6 + $0x18] sm:$0xff] }
 0x46f   :  { %682 = vmatpush.bf16.msra.mxu1 %v1627_v16  ;;  %v1628_v16 = vld [vmem:[%s2216_s3 + $0x10] sm:$0xff] }
 0x470   :  { %1494 = vmatmul.msk.bf16.gmra.mxu1 %vm150_vm3, %v408_v18  ;;  %v1626_v18 = vld [vmem:[%s2221_s6 + $0x10] sm:$0xff] }
 0x473   :  { %683 = vmatpush.bf16.msra.mxu1 %v1626_v18 }
 0x4aa   :  { %v471_v19 = vpop.f32.mrf.mxu0 }
 0x4b2   :  { %v473_v24 = vpop.f32.mrf.mxu0 }
 0x4b6   :  { %v430_v22 = vpop.f32.mrf.mxu1 }
 0x4be   :  { %v432_v25 = vpop.f32.mrf.mxu1 }
 0x4bf   :  { %v1667_v26 = vpack.i.bf16 %v473_v24, %v432_v25 }
 0x4c1   :  { %1668 = vrot.lane.b32.xlu1 %v1667_v26, %s1804_s13 }
 0x4e0   :  { %v476_v27 = vpop.f32.mrf.mxu0 }
 0x4e8   :  { %v478_v30 = vpop.f32.mrf.mxu0 }
 0x4ed   :  { %v435_v28 = vpop.f32.mrf.mxu1 }
 0x4ee   :  { %v1672_v0 = vpack.i.bf16 %v476_v27, %v435_v28 }
 0x4f0   :  { %1673 = vrot.lane.b32.xlu0 %v1672_v0, %s1805_s14 }
 0x4f5   :  { %v437_v54 = vpop.f32.mrf.mxu1 }
 0x4f6   :  { %v1677_v32 = vpack.i.bf16 %v478_v30, %v437_v54 }
 0x4f8   :  { %1678 = vrot.lane.b32.xlu2 %v1677_v32, %s1806_s15 }
 0x533   :  { %v1669_v9 = vpop.permute.xlu1 %1668 }
 0x534   :  { %v1671_v35 = vunpack.i.h.bf16 %v1669_v9  ;;  %v1670_v36 = vunpack.i.l.bf16 %v1669_v9 }
 0x536   :  { %v506_v40 = vsel %vm210_vm4, %v471_v19, %v1671_v35  ;;  %v505_v41 = vsel %vm210_vm4, %v430_v22, %v1670_v36  ;;  %v598_v36 = vperm.slane %v2018_v51, 1 }
 0x552   :  { %v1679_v37 = vpop.permute.xlu2 %1678 }
 0x553   :  { %v1681_v42 = vunpack.i.h.bf16 %v1679_v37  ;;  %v1680_v43 = vunpack.i.l.bf16 %v1679_v37 }
 0x562   :  { %v1674_v38 = vpop.permute.xlu0 %1673 }
 0x563   :  { %v1676_v33 = vunpack.i.h.bf16 %v1674_v38  ;;  %v1675_v39 = vunpack.i.l.bf16 %v1674_v38 }
 0x565   :  { %v509_v44 = vsel %vm507_vm1, %v506_v40, %v1676_v33  ;;  %v508_v45 = vsel %vm507_vm1, %v505_v41, %v1675_v39  ;;  %v601_v41 = vperm.slane %v2018_v51, 2 }
 0x566   :  { %v511_v46 = vsel %vm510_vm5, %v508_v45, %v1680_v43  ;;  %v512_v47 = vsel %vm510_vm5, %v509_v44, %v1681_v42 }
 0x567   :  { %v513_v48 = vpack.c.bf16 %v512_v47, %v511_v46  ;;  %v1625_v46 = vld [vmem:[%s2221_s6 + $0x8] sm:$0xff]  ;;  %v1624_v47 = vld [vmem:[%s2221_s6] sm:$0xff] }
 0x568   :  { %684 = vmatpush.bf16.msra.mxu1 %v1625_v46  ;;  %v745_v46 = vperm.slane %v2018_v51, 6 }
 0x569   :  { %1505 = vmatmul.msk.bf16.vlgmr.msrb.gmra.mxu2 %vm150_vm3, %v513_v48 }
 0x56c   :  { %685 = vmatpush.bf16.msra.mxu1 %v1624_v47 }
 0x5ec   :  { %v543_v49 = vpop.f32.mrf.mxu2 }
 0x5ed   :  { %v544_v53 = vadd.f32 %v543_v49, %v518_v52 }
 0x5ef   :  { %v548_v56 = vadd.f32 %v544_v53, %v1895_v20 }
 0x5f1   :  { %v550_v57 = vsel %vm150_vm3, %v548_v56, 0.0  ;;  %v556_v50 = vmul.f32 %v548_v56, %v548_v56 }
 0x5f2   :  { %551 = vadd.xlane.f32.xlu0 %v550_v57 }
 0x5f3   :  { %v558_v58 = vsel %vm150_vm3, %v556_v50, 0.0 }
 0x5f4   :  { %v545_v60 = vpop.f32.mrf.mxu2  ;;  %559 = vadd.xlane.f32.xlu2 %v558_v58 }
 0x5f5   :  { %v546_v61 = vadd.f32 %v545_v60, %v518_v52  ;;  %v609_v52 = vperm.slane %v2018_v51, 3  ;;  %v650_v60 = vperm.slane %v2018_v51, 4 }
 0x5f7   :  { %v549_v62 = vadd.f32 %v546_v61, %v1897_v21  ;;  %v1622_v21 = vld [vmem:[%s2220_s5] sm:$0xff] }
 0x5f8   :  { %632 = vmatpush.bf16.msrb.mxu3 %v1622_v21 }
 0x5f9   :  { %v553_v59 = vsel %vm150_vm3, %v549_v62, 0.0  ;;  %v557_v63 = vmul.f32 %v549_v62, %v549_v62 }
 0x5fa   :  { %554 = vadd.xlane.f32.xlu1 %v553_v59 }
 0x5fb   :  { %v561_v55 = vsel %vm150_vm3, %v557_v63, 0.0 }
 0x5fc   :  { %562 = vadd.xlane.f32.xlu0 %v561_v55 }
 0x665   :  { %v552_v1 = vpop.xlane.xlu0 %551 }
 0x666   :  { %v564_v20 = vmul.f32 0.03125, %v552_v1 }
 0x667   :  { %v560_v2 = vpop.xlane.xlu2 %559 }
 0x668   :  { %v568_v3 = vmul.f32 %v564_v20, %v564_v20  ;;  %v566_v4 = vmul.f32 0.03125, %v560_v2  ;;  %v572_v34 = vsub.f32 %v548_v56, %v564_v20 }
 0x66a   :  { %v570_v8 = vsub.f32 %v566_v4, %v568_v3 }
 0x66c   :  { %v574_v10 = vadd.f32 1e-05, %v570_v8 }
 0x66d   :  { %v555_v7 = vpop.xlane.xlu1 %554 }
 0x66e   :  { %1744 = vrsqrt.f32 %v574_v10  ;;  %v565_v11 = vmul.f32 0.03125, %v555_v7  ;;  %vm582_vm7 = vweird.f32 %v574_v10 }
 0x66f   :  { %v563_v12 = vpop.xlane.xlu0 %562 }
 0x670   :  { %v569_v13 = vmul.f32 %v565_v11, %v565_v11  ;;  %v567_v15 = vmul.f32 0.03125, %v563_v12  ;;  %v573_v38 = vsub.f32 %v549_v62, %v565_v11 }
 0x672   :  { %v571_v17 = vsub.f32 %v567_v15, %v569_v13  ;;  %v1629_v13 = vld [vmem:[%s2216_s3 + $0x18] sm:$0xff] }
 0x673   :  { %777 = vmatpush.bf16.msra.mxu0 %v1629_v13 }
 0x674   :  { %v1745_v19 = vpop.eup %1744  ;;  %v575_v22 = vadd.f32 1e-05, %v571_v17 }
 0x675   :  { %v577_v24 = vmul.f32 %v1745_v19, %v574_v10  ;;  %vm583_vm6 = vweird.f32 %v1745_v19 }
 0x676   :  { %1746 = vrsqrt.f32 %v575_v22  ;;  %vm584_vm8 = vmor %vm582_vm7, %vm583_vm6  ;;  %vm592_vm10 = vweird.f32 %v575_v22 }
 0x677   :  { %v578_v25 = vmul.f32 %v1745_v19, %v577_v24  ;;  %778 = vmatpush.bf16.msra.mxu0 %v1628_v16 }
 0x679   :  { %v579_v26 = vmul.f32 0.5, %v578_v25 }
 0x67b   :  { %v580_v27 = vsub.f32 1.5, %v579_v26 }
 0x67c   :  { %v1747_v28 = vpop.eup %1746 }
 0x67d   :  { %v581_v0 = vmul.f32 %v1745_v19, %v580_v27  ;;  %v587_v30 = vmul.f32 %v1747_v28, %v575_v22  ;;  %vm593_vm9 = vweird.f32 %v1747_v28 }
 0x67e   :  { %vm594_vm11 = vmor %vm592_vm10, %vm593_vm9 }
 0x67f   :  { %v588_v54 = vmul.f32 %v1747_v28, %v587_v30  ;;  %v585_v32 = vsel %vm584_vm8, %v1745_v19, %v581_v0 }
 0x680   :  { %v596_v35 = vmul.f32 %v585_v32, %v572_v34 }
 0x681   :  { %v589_v31 = vmul.f32 0.5, %v588_v54 }
 0x682   :  { %v599_v40 = vmul.f32 %v598_v36, %v596_v35 }
 0x683   :  { %v590_v9 = vsub.f32 1.5, %v589_v31 }
 0x684   :  { %v602_v43 = vadd.f32 %v601_v41, %v599_v40 }
 0x685   :  { %v591_v37 = vmul.f32 %v1747_v28, %v590_v9 }
 0x687   :  { %v595_v33 = vsel %vm594_vm11, %v1747_v28, %v591_v37 }
 0x688   :  { %v597_v39 = vmul.f32 %v595_v33, %v573_v38 }
 0x68a   :  { %v600_v42 = vmul.f32 %v598_v36, %v597_v39  ;;  %v742_v39 = vperm.slane %v2018_v51, 5 }
 0x68c   :  { %v603_v44 = vadd.f32 %v601_v41, %v600_v42 }
 0x68e   :  { %v604_v45 = vpack.c.bf16 %v603_v44, %v602_v43 }
 0x690   :  { %1514 = vmatmul.msk.bf16.vlgmr.msrb.gmra.mxu3 %vm150_vm3, %v604_v45 }
 0x713   :  { %v634_v48 = vpop.f32.mrf.mxu3 }
 0x714   :  { %v635_v49 = vadd.f32 %v634_v48, %v609_v52 }
 0x716   :  { %v639_v57 = vmax.f32 %v635_v49, 0.0 }
 0x71b   :  { %v636_v53 = vpop.f32.mrf.mxu3 }
 0x71c   :  { %v637_v56 = vadd.f32 %v636_v53, %v609_v52 }
 0x71e   :  { %v640_v50 = vmax.f32 %v637_v56, 0.0 }
 0x720   :  { %v641_v58 = vpack.c.bf16 %v640_v50, %v639_v57 }
 0x722   :  { %1531 = vmatmul.msk.bf16.vlgmr.msra.gmra.mxu1 %vm85_vm2, %v641_v58 }
 0x79f   :  { %v687_v61 = vpop.f32.mrf.mxu1 }
 0x7a0   :  { %v688_v62 = vadd.f32 %v687_v61, %v650_v60 }
 0x7a2   :  { %v692_v59 = vadd.f32 %v688_v62, %v602_v43 }
 0x7a4   :  { %v694_v63 = vsel %vm150_vm3, %v692_v59, 0.0  ;;  %v700_v55 = vmul.f32 %v692_v59, %v692_v59 }
 0x7a5   :  { %695 = vadd.xlane.f32.xlu1 %v694_v63 }
 0x7a6   :  { %v702_v1 = vsel %vm150_vm3, %v700_v55, 0.0 }
 0x7a7   :  { %v689_v20 = vpop.f32.mrf.mxu1  ;;  %703 = vadd.xlane.f32.xlu0 %v702_v1 }
 0x7a8   :  { %v690_v2 = vadd.f32 %v689_v20, %v650_v60 }
 0x7aa   :  { %v693_v3 = vadd.f32 %v690_v2, %v603_v44 }
 0x7ac   :  { %v697_v4 = vsel %vm150_vm3, %v693_v3, 0.0  ;;  %v701_v5 = vmul.f32 %v693_v3, %v693_v3 }
 0x7ad   :  { %698 = vadd.xlane.f32.xlu2 %v697_v4 }
 0x7ae   :  { %v705_v8 = vsel %vm150_vm3, %v701_v5, 0.0 }
 0x7af   :  { %706 = vadd.xlane.f32.xlu1 %v705_v8 }
 0x818   :  { %v696_v21 = vpop.xlane.xlu1 %695 }
 0x819   :  { %v708_v10 = vmul.f32 0.03125, %v696_v21 }
 0x81a   :  { %v704_v7 = vpop.xlane.xlu0 %703 }
 0x81b   :  { %v712_v11 = vmul.f32 %v708_v10, %v708_v10  ;;  %v710_v12 = vmul.f32 0.03125, %v704_v7  ;;  %v716_v38 = vsub.f32 %v692_v59, %v708_v10 }
 0x81d   :  { %v714_v15 = vsub.f32 %v710_v12, %v712_v11 }
 0x81f   :  { %v718_v17 = vadd.f32 1e-05, %v714_v15 }
 0x820   :  { %v699_v18 = vpop.xlane.xlu2 %698 }
 0x821   :  { %1748 = vrsqrt.f32 %v718_v17  ;;  %v709_v19 = vmul.f32 0.03125, %v699_v18  ;;  %vm726_vm13 = vweird.f32 %v718_v17 }
 0x822   :  { %v707_v22 = vpop.xlane.xlu1 %706 }
 0x823   :  { %v713_v24 = vmul.f32 %v709_v19, %v709_v19  ;;  %v711_v25 = vmul.f32 0.03125, %v707_v22  ;;  %v717_v42 = vsub.f32 %v693_v3, %v709_v19 }
 0x825   :  { %v715_v26 = vsub.f32 %v711_v25, %v713_v24 }
 0x827   :  { %v1749_v27 = vpop.eup %1748  ;;  %v719_v28 = vadd.f32 1e-05, %v715_v26 }
 0x828   :  { %v721_v0 = vmul.f32 %v1749_v27, %v718_v17  ;;  %vm727_vm12 = vweird.f32 %v1749_v27 }
 0x829   :  { %1750 = vrsqrt.f32 %v719_v28  ;;  %vm728_vm14 = vmor %vm726_vm13, %vm727_vm12  ;;  %vm736_vm0 = vweird.f32 %v719_v28 }
 0x82a   :  { %v722_v30 = vmul.f32 %v1749_v27, %v721_v0 }
 0x82c   :  { %v723_v54 = vmul.f32 0.5, %v722_v30 }
 0x82e   :  { %v724_v32 = vsub.f32 1.5, %v723_v54 }
 0x82f   :  { %v1751_v31 = vpop.eup %1750 }
 0x830   :  { %v725_v34 = vmul.f32 %v1749_v27, %v724_v32  ;;  %v731_v9 = vmul.f32 %v1751_v31, %v719_v28  ;;  %vm737_vm15 = vweird.f32 %v1751_v31 }
 0x831   :  { %vm738_vm6 = vmor %vm736_vm0, %vm737_vm15 }
 0x832   :  { %v732_v35 = vmul.f32 %v1751_v31, %v731_v9  ;;  %v729_v36 = vsel %vm728_vm14, %v1749_v27, %v725_v34 }
 0x833   :  { %v740_v40 = vmul.f32 %v729_v36, %v716_v38 }
 0x834   :  { %v733_v37 = vmul.f32 0.5, %v732_v35 }
 0x835   :  { %v743_v44 = vmul.f32 %v742_v39, %v740_v40 }
 0x836   :  { %v734_v33 = vsub.f32 1.5, %v733_v37 }
 0x837   :  { %v2063_v48 = vadd.f32 %v745_v46, %v743_v44 }
 0x838   :  { %v735_v41 = vmul.f32 %v1751_v31, %v734_v33 }
 0x83a   :  { %v739_v43 = vsel %vm738_vm6, %v1751_v31, %v735_v41 }
 0x83b   :  { %v741_v45 = vmul.f32 %v739_v43, %v717_v42 }
 0x83d   :  { %v744_v47 = vmul.f32 %v742_v39, %v741_v45 }
 0x83f   :  { %v2065_v52 = vadd.f32 %v745_v46, %v744_v47 }
 0x841   :  { %v750_v49 = vpack.c.bf16 %v2065_v52, %v2063_v48 }
 0x843   :  { %1545 = vmatmul.msk.bf16.vlgmr.msra.gmra.mxu0 %vm150_vm3, %v750_v49 }
 0x8c0   :  { %v780_v53 = vpop.f32.mrf.mxu0 }
 0x8c1   :  { %v805_v60 = vpack.c.bf16 %v780_v53, %v780_v53 }
 0x8c3   :  { %v817_v21 = vunpack.c.l.b16 %v805_v60 }
 0x8c8   :  { %v782_v56 = vpop.f32.mrf.mxu0 }
 0x8c9   :  { %v1692_v57 = vpack.i.bf16 %v782_v56, %v780_v53  ;;  %v809_v18 = vpack.c.bf16 %v782_v56, %v782_v56 }
 0x8cb   :  { %1693 = vrot.lane.b32.xlu1 %v1692_v57, %s1798_s29  ;;  %1688 = vrot.lane.b32.xlu0 %v1692_v57, %s1800_s2  ;;  %v862_v22 = vunpack.c.l.b16 %v809_v18 }
 0x8cc   :  { %1683 = vrot.lane.b32.xlu2 %v1692_v57, %s1799_s30 }
 0x926   :  { %v1684_v51 = vpop.permute.xlu2 %1683 }
 0x927   :  { %v1686_v50 = vunpack.i.h.bf16 %v1684_v51  ;;  %v1685_v58 = vunpack.i.l.bf16 %v1684_v51 }
 0x929   :  { %v811_v61 = vpack.c.bf16 %v1686_v50, %v1686_v50  ;;  %v807_v63 = vpack.c.bf16 %v1685_v58, %v1685_v58 }
 0x92b   :  { %v864_v5 = vunpack.c.l.b16 %v811_v61  ;;  %v819_v10 = vunpack.c.l.b16 %v807_v63 }
 0x93d   :  { %v1694_v62 = vpop.permute.xlu1 %1693  ;;  %v1689_v59 = vpop.permute.xlu0 %1688 }
 0x93e   :  { %v1695_v55 = vunpack.i.l.bf16 %v1694_v62  ;;  %v1691_v1 = vunpack.i.h.bf16 %v1689_v59  ;;  %v1690_v20 = vunpack.i.l.bf16 %v1689_v59  ;;  %v1696_v8 = vunpack.i.h.bf16 %v1694_v62 }
 0x940   :  { %v806_v2 = vpack.c.bf16 %v1695_v55, %v1695_v55  ;;  %v812_v3 = vpack.c.bf16 %v1691_v1, %v1691_v1  ;;  %v808_v4 = vpack.c.bf16 %v1690_v20, %v1690_v20  ;;  %v810_v17 = vpack.c.bf16 %v1696_v8, %v1696_v8 }
 0x942   :  { %v818_v7 = vunpack.c.l.b16 %v806_v2  ;;  %v865_v11 = vunpack.c.l.b16 %v812_v3  ;;  %v820_v12 = vunpack.c.l.b16 %v808_v4  ;;  %v863_v19 = vunpack.c.l.b16 %v810_v17 }
 0x944   :  { %v2073_v13 = vpack.c.b16 %v818_v7, %v817_v21  ;;  %v2075_v15 = vpack.c.b16 %v865_v11, %v864_v5  ;;  %v822_v16 = vpack.c.b16 %v820_v12, %v819_v10  ;;  %v2082_v24 = vpack.c.b16 %v863_v19, %v862_v22 }
 0x946   :  { %823 = vrot.lane.b32.xlu1 %v2073_v13, %s1801_s11  ;;  %870 = vrot.lane.b32.xlu2 %v2075_v15, %s1801_s11 }
 0x947   :  { %825 = vrot.lane.b32.xlu0 %v822_v16, %s1801_s11 }
 0x94e   :  { %1027 = vrot.lane.b32.xlu2 %v822_v16, %s1803_s12 }
 0x94f   :  { %868 = vrot.lane.b32.xlu0 %v2082_v24, %s1801_s11 }
 0x9a0   :  { %v871_v25 = vpop.permute.xlu2 %870 }
 0x9a1   :  { %v882_v26 = vsel %vm210_vm4, %v871_v25, 0 }
 0x9a2   :  { %890 = vmatpush.bf16.xpose.msra.mxu3 %v882_v26 }
 0x9a8   :  { %v1028_v27 = vpop.permute.xlu2 %1027 }
 0x9a9   :  { %1043 = vmatpush.bf16.msrb.mxu1 %v1028_v27 }
 0x9b8   :  { %v824_v30 = vpop.permute.xlu1 %823 }
 0x9b9   :  { %v826_v28 = vpop.permute.xlu0 %825  ;;  %v834_v32 = vsel %vm210_vm4, %v824_v30, 0 }
 0x9ba   :  { %v837_v0 = vsel %vm210_vm4, %v826_v28, 0 }
 0x9bb   :  { %845 = vmatpush.bf16.xpose.msra.mxu2 %v837_v0 }
 0x9c1   :  { %v869_v54 = vpop.permute.xlu0 %868 }
 0x9c2   :  { %v879_v31 = vsel %vm210_vm4, %v869_v54, 0 }
 0x9c3   :  { %846 = vmatpush.bf16.xpose.msra.mxu2 %v834_v32  ;;  %891 = vmatpush.bf16.xpose.msra.mxu3 %v879_v31 }
 0x9ca   :  { %1546 = vmatmul.msk.bf16.vlgmr.msra.gmra.mxu2 %vm210_vm4, %v2073_v13  ;;  %1548 = vmatmul.msk.bf16.vlgmr.msra.gmra.mxu3 %vm210_vm4, %v2082_v24 }
 0x9da   :  { %1547 = vmatmul.msk.bf16.gmra.mxu2 %vm210_vm4, %v822_v16  ;;  %1549 = vmatmul.msk.bf16.gmra.mxu3 %vm210_vm4, %v2075_v15 }
 0xa4d   :  { %v848_v34 = vpop.f32.mrf.mxu2  ;;  %v893_v9 = vpop.f32.mrf.mxu3 }
 0xa4e   :  { %v903_v35 = vmul.f32 0.35355338, %v848_v34  ;;  %v907_v36 = vmul.f32 0.35355338, %v893_v9 }
 0xa50   :  { %v911_v37 = vadd.f32 %v903_v35, %v1936_v6  ;;  %v915_v38 = vadd.f32 %v907_v36, %v1936_v6 }
 0xa52   :  { %v919_v33 = vsel %vm150_vm3, %v911_v37, -inf  ;;  %v931_v39 = vsel %vm150_vm3, %v915_v38, -inf }
 0xa53   :  { %920 = vmax.xlane.f32.xlu2 %v919_v33  ;;  %932 = vmax.xlane.f32.xlu0 %v931_v39 }
 0xa55   :  { %v850_v40 = vpop.f32.mrf.mxu2  ;;  %v895_v41 = vpop.f32.mrf.mxu3 }
 0xa56   :  { %v904_v42 = vmul.f32 0.35355338, %v850_v40  ;;  %v908_v43 = vmul.f32 0.35355338, %v895_v41 }
 0xa58   :  { %v912_v44 = vadd.f32 %v904_v42, %v1941_v14  ;;  %v916_v45 = vadd.f32 %v908_v43, %v1941_v14 }
 0xa5a   :  { %v922_v46 = vsel %vm150_vm3, %v912_v44, -inf  ;;  %v934_v47 = vsel %vm150_vm3, %v916_v45, -inf }
 0xa5b   :  { %923 = vmax.xlane.f32.xlu1 %v922_v46  ;;  %935 = vmax.xlane.f32.xlu2 %v934_v47 }
 0xa5d   :  { %v853_v6 = vpop.f32.mrf.mxu2  ;;  %v898_v49 = vpop.f32.mrf.mxu3 }
 0xa5e   :  { %v905_v53 = vmul.f32 0.35355338, %v853_v6  ;;  %v909_v56 = vmul.f32 0.35355338, %v898_v49 }
 0xa60   :  { %v913_v57 = vadd.f32 %v905_v53, %v1946_v23  ;;  %v917_v51 = vadd.f32 %v909_v56, %v1946_v23 }
 0xa62   :  { %v925_v50 = vsel %vm150_vm3, %v913_v57, -inf  ;;  %v937_v58 = vsel %vm150_vm3, %v917_v51, -inf }
 0xa63   :  { %926 = vmax.xlane.f32.xlu1 %v925_v50  ;;  %938 = vmax.xlane.f32.xlu2 %v937_v58 }
 0xa65   :  { %v855_v14 = vpop.f32.mrf.mxu2  ;;  %v900_v60 = vpop.f32.mrf.mxu3 }
 0xa66   :  { %v906_v61 = vmul.f32 0.35355338, %v855_v14  ;;  %v910_v62 = vmul.f32 0.35355338, %v900_v60 }
 0xa68   :  { %v914_v59 = vadd.f32 %v906_v61, %v1951_v29  ;;  %v918_v63 = vadd.f32 %v910_v62, %v1951_v29 }
 0xa6a   :  { %v928_v55 = vsel %vm150_vm3, %v914_v59, -inf  ;;  %v940_v1 = vsel %vm150_vm3, %v918_v63, -inf }
 0xa6b   :  { %929 = vmax.xlane.f32.xlu0 %v928_v55  ;;  %941 = vmax.xlane.f32.xlu1 %v940_v1 }
 0xac6   :  { %v921_v23 = vpop.xlane.xlu2 %920  ;;  %v933_v20 = vpop.xlane.xlu0 %932 }
 0xac7   :  { %v943_v2 = vsub.f32 %v911_v37, %v921_v23  ;;  %v947_v3 = vsub.f32 %v915_v38, %v933_v20 }
 0xac9   :  { %v951_v4 = vmul.f32 1.442695, %v943_v2  ;;  %v959_v5 = vmul.f32 1.442695, %v947_v3 }
 0xacb   :  { %1752 = vpow2.f32 %v951_v4 }
 0xacc   :  { %1754 = vpow2.f32 %v959_v5 }
 0xace   :  { %v924_v8 = vpop.xlane.xlu1 %923  ;;  %v936_v18 = vpop.xlane.xlu2 %935 }
 0xacf   :  { %v944_v21 = vsub.f32 %v912_v44, %v924_v8  ;;  %v948_v19 = vsub.f32 %v916_v45, %v936_v18 }
 0xad1   :  { %v1753_v10 = vpop.eup %1752  ;;  %v953_v7 = vmul.f32 1.442695, %v944_v21  ;;  %v961_v26 = vmul.f32 1.442695, %v948_v19 }
 0xad2   :  { %v2114_v11 = vpop.eup %1754  ;;  %v967_v29 = vsel %vm150_vm3, %v1753_v10, 0.0 }
 0xad3   :  { %1756 = vpow2.f32 %v953_v7  ;;  %968 = vadd.xlane.f32.xlu0 %v967_v29  ;;  %v979_v12 = vsel %vm150_vm3, %v2114_v11, 0.0 }
 0xad4   :  { %980 = vadd.xlane.f32.xlu1 %v979_v12  ;;  %1758 = vpow2.f32 %v961_v26 }
 0xad6   :  { %v927_v22 = vpop.xlane.xlu1 %926  ;;  %v939_v0 = vpop.xlane.xlu2 %938 }
 0xad7   :  { %v945_v28 = vsub.f32 %v913_v57, %v927_v22  ;;  %v949_v54 = vsub.f32 %v917_v51, %v939_v0 }
 0xad9   :  { %v1757_v16 = vpop.eup %1756  ;;  %v955_v32 = vmul.f32 1.442695, %v945_v28  ;;  %v963_v34 = vmul.f32 1.442695, %v949_v54 }
 0xada   :  { %v970_v17 = vsel %vm150_vm3, %v1757_v16, 0.0 }
 0xadb   :  { %971 = vadd.xlane.f32.xlu2 %v970_v17 }
 0xade   :  { %v930_v25 = vpop.xlane.xlu0 %929  ;;  %v942_v31 = vpop.xlane.xlu1 %941 }
 0xadf   :  { %v946_v27 = vsub.f32 %v914_v59, %v930_v25 }
 0xae1   :  { %v957_v30 = vmul.f32 1.442695, %v946_v27 }
 0xae3   :  { %1760 = vpow2.f32 %v957_v30 }
 0xae4   :  { %1762 = vpow2.f32 %v955_v32 }
 0xae5   :  { %1764 = vpow2.f32 %v963_v34 }
 0xae7   :  { %1025 = vrot.lane.b32.xlu0 %v2073_v13, %s1803_s12  ;;  %v1759_v13 = vpop.eup %1758 }
 0xae9   :  { %v1761_v9 = vpop.eup %1760 }
 0xaea   :  { %v1763_v36 = vpop.eup %1762  ;;  %v976_v37 = vsel %vm150_vm3, %v1761_v9, 0.0 }
 0xaeb   :  { %v1765_v38 = vpop.eup %1764  ;;  %v973_v33 = vsel %vm150_vm3, %v1763_v36, 0.0 }
 0xaec   :  { %v985_v39 = vsel %vm150_vm3, %v1765_v38, 0.0 }
 0xaed   :  { %1068 = vrot.lane.b32.xlu1 %v2075_v15, %s1803_s12  ;;  %v950_v15 = vsub.f32 %v918_v63, %v942_v31 }
 0xaef   :  { %v965_v35 = vmul.f32 1.442695, %v950_v15 }
 0xaf1   :  { %1766 = vpow2.f32 %v965_v35 }
 0xaf3   :  { %1066 = vrot.lane.b32.xlu2 %v2082_v24, %s1803_s12  ;;  %v982_v24 = vsel %vm150_vm3, %v1759_v13, 0.0 }
 0xaf7   :  { %v1767_v40 = vpop.eup %1766 }
 0xaf8   :  { %v988_v41 = vsel %vm150_vm3, %v1767_v40, 0.0 }
 0xb11   :  { %983 = vadd.xlane.f32.xlu0 %v982_v24 }
 0xb17   :  { %977 = vadd.xlane.f32.xlu1 %v976_v37 }
 0xb19   :  { %974 = vadd.xlane.f32.xlu0 %v973_v33  ;;  %v1631_v33 = vld [vmem:[%s2218_s4 + $0x18] sm:$0xff] }
 0xb1a   :  { %1155 = vmatpush.bf16.msrb.mxu2 %v1631_v33 }
 0xb1c   :  { %986 = vadd.xlane.f32.xlu2 %v985_v39  ;;  %v1630_v39 = vld [vmem:[%s2218_s4 + $0x10] sm:$0xff] }
 0xb1e   :  { %1156 = vmatpush.bf16.msrb.mxu2 %v1630_v39 }
 0xb21   :  { %989 = vadd.xlane.f32.xlu0 %v988_v41 }
 0xb46   :  { %v969_v42 = vpop.xlane.xlu0 %968 }
 0xb47   :  { %1768 = vrcp.f32 %v969_v42  ;;  %v981_v49 = vpop.xlane.xlu1 %980 }
 0xb4d   :  { %v1769_v44 = vpop.eup %1768 }
 0xb4e   :  { %v972_v43 = vpop.xlane.xlu2 %971  ;;  %v999_v45 = vmul.f32 %v1769_v44, %v1753_v10 }
 0xb4f   :  { %1770 = vrcp.f32 %v972_v43 }
 0xb50   :  { %v1007_v47 = vpack.c.bf16 %v999_v45, %v999_v45  ;;  %1772 = vrcp.f32 %v981_v49 }
 0xb52   :  { %v1019_v57 = vunpack.c.l.b16 %v1007_v47 }
 0xb55   :  { %v1771_v46 = vpop.eup %1770 }
 0xb56   :  { %v1000_v6 = vmul.f32 %v1771_v46, %v1757_v16  ;;  %v1067_v14 = vpop.permute.xlu2 %1066  ;;  %v1773_v61 = vpop.eup %1772 }
 0xb57   :  { %v1003_v62 = vmul.f32 %v1773_v61, %v2114_v11 }
 0xb58   :  { %v1008_v53 = vpack.c.bf16 %v1000_v6, %v1000_v6 }
 0xb59   :  { %v1026_v56 = vpop.permute.xlu0 %1025  ;;  %v1011_v55 = vpack.c.bf16 %v1003_v62, %v1003_v62 }
 0xb5a   :  { %v1020_v51 = vunpack.c.l.b16 %v1008_v53  ;;  %1044 = vmatpush.bf16.msrb.mxu1 %v1026_v56 }
 0xb5b   :  { %v1060_v3 = vunpack.c.l.b16 %v1011_v55 }
 0xb5c   :  { %v1023_v50 = vpack.c.b16 %v1020_v51, %v1019_v57 }
 0xb5e   :  { %1550 = vmatmul.msk.bf16.vlgmr.msrb.gmra.mxu1 %vm150_vm3, %v1023_v50 }
 0xb5f   :  { %v1069_v58 = vpop.permute.xlu1 %1068 }
 0xb60   :  { %1084 = vmatpush.bf16.msrb.mxu0 %v1069_v58 }
 0xb64   :  { %1085 = vmatpush.bf16.msrb.mxu0 %v1067_v14  ;;  %v2155_v14 = vld [vmem:[%s2219_s8 + $0x8] sm:$0xff] }
 0xb84   :  { %v984_v60 = vpop.xlane.xlu0 %983 }
 0xb85   :  { %1774 = vrcp.f32 %v984_v60  ;;  %v1133_v60 = vperm.slane %v2155_v14, 0 }
 0xb8a   :  { %v978_v59 = vpop.xlane.xlu1 %977 }
 0xb8b   :  { %v1775_v63 = vpop.eup %1774  ;;  %1776 = vrcp.f32 %v978_v59 }
 0xb8c   :  { %v1004_v1 = vmul.f32 %v1775_v63, %v1759_v13  ;;  %v975_v23 = vpop.xlane.xlu0 %974 }
 0xb8d   :  { %1778 = vrcp.f32 %v975_v23 }
 0xb8e   :  { %v1012_v20 = vpack.c.bf16 %v1004_v1, %v1004_v1 }
 0xb8f   :  { %v987_v2 = vpop.xlane.xlu2 %986 }
 0xb90   :  { %v1061_v4 = vunpack.c.l.b16 %v1012_v20  ;;  %1780 = vrcp.f32 %v987_v2 }
 0xb91   :  { %v1777_v5 = vpop.eup %1776 }
 0xb92   :  { %v1064_v8 = vpack.c.b16 %v1061_v4, %v1060_v3  ;;  %v1002_v21 = vmul.f32 %v1777_v5, %v1761_v9 }
 0xb93   :  { %v1779_v10 = vpop.eup %1778 }
 0xb94   :  { %v990_v7 = vpop.xlane.xlu0 %989  ;;  %1552 = vmatmul.msk.bf16.vlgmr.msrb.gmra.mxu0 %vm150_vm3, %v1064_v8  ;;  %v1001_v11 = vmul.f32 %v1779_v10, %v1763_v36  ;;  %v1010_v29 = vpack.c.bf16 %v1002_v21, %v1002_v21 }
 0xb95   :  { %1782 = vrcp.f32 %v990_v7 }
 0xb96   :  { %v1781_v12 = vpop.eup %1780  ;;  %v1009_v16 = vpack.c.bf16 %v1001_v11, %v1001_v11  ;;  %v1022_v18 = vunpack.c.l.b16 %v1010_v29  ;;  %v1633_v11 = vld [vmem:[%s2220_s5 + $0x18] sm:$0xff] }
 0xb97   :  { %v1005_v19 = vmul.f32 %v1781_v12, %v1765_v38  ;;  %1247 = vmatpush.bf16.msrb.mxu3 %v1633_v11 }
 0xb98   :  { %v1021_v17 = vunpack.c.l.b16 %v1009_v16 }
 0xb99   :  { %v1013_v27 = vpack.c.bf16 %v1005_v19, %v1005_v19 }
 0xb9a   :  { %v1024_v22 = vpack.c.b16 %v1022_v18, %v1021_v17 }
 0xb9b   :  { %v1783_v25 = vpop.eup %1782  ;;  %v1062_v0 = vunpack.c.l.b16 %v1013_v27  ;;  %v1636_v27 = vld [vmem:[%s2221_s6 + $0x30] sm:$0xff] }
 0xb9c   :  { %1551 = vmatmul.msk.bf16.gmra.mxu1 %vm150_vm3, %v1024_v22  ;;  %v1006_v26 = vmul.f32 %v1783_v25, %v1767_v40  ;;  %v1637_v25 = vld [vmem:[%s2221_s6 + $0x38] sm:$0xff] }
 0xb9d   :  { %1299 = vmatpush.bf16.msra.mxu1 %v1637_v25 }
 0xb9e   :  { %v1014_v28 = vpack.c.bf16 %v1006_v26, %v1006_v26 }
 0xba0   :  { %v1063_v30 = vunpack.c.l.b16 %v1014_v28 }
 0xba1   :  { %1300 = vmatpush.bf16.msra.mxu1 %v1636_v27 }
 0xba2   :  { %v1065_v54 = vpack.c.b16 %v1063_v30, %v1062_v0 }
 0xba4   :  { %1553 = vmatmul.msk.bf16.gmra.mxu0 %vm150_vm3, %v1065_v54 }
 0xbdb   :  { %v1046_v32 = vpop.f32.mrf.mxu1 }
 0xbe3   :  { %v1048_v13 = vpop.f32.mrf.mxu1 }
 0xc11   :  { %v1087_v31 = vpop.f32.mrf.mxu0 }
 0xc19   :  { %v1089_v34 = vpop.f32.mrf.mxu0  ;;  %v1051_v24 = vpop.f32.mrf.mxu1 }
 0xc1a   :  { %v1697_v15 = vpack.i.bf16 %v1089_v34, %v1048_v13 }
 0xc1c   :  { %1698 = vrot.lane.b32.xlu2 %v1697_v15, %s1804_s13 }
 0xc21   :  { %v1092_v9 = vpop.f32.mrf.mxu0  ;;  %v1053_v36 = vpop.f32.mrf.mxu1 }
 0xc22   :  { %v1702_v35 = vpack.i.bf16 %v1092_v9, %v1051_v24 }
 0xc24   :  { %1703 = vrot.lane.b32.xlu1 %v1702_v35, %s1805_s14 }
 0xc29   :  { %v1094_v37 = vpop.f32.mrf.mxu0 }
 0xc2a   :  { %v1707_v38 = vpack.i.bf16 %v1094_v37, %v1053_v36 }
 0xc2c   :  { %1708 = vrot.lane.b32.xlu0 %v1707_v38, %s1806_s15  ;;  %v1213_v38 = vperm.slane %v2155_v14, 1 }
 0xc76   :  { %v1699_v40 = vpop.permute.xlu2 %1698 }
 0xc77   :  { %v1701_v42 = vunpack.i.h.bf16 %v1699_v40  ;;  %v1700_v43 = vunpack.i.l.bf16 %v1699_v40 }
 0xc79   :  { %v1122_v47 = vsel %vm210_vm4, %v1087_v31, %v1701_v42  ;;  %v1121_v6 = vsel %vm210_vm4, %v1046_v32, %v1700_v43 }
 0xc96   :  { %v1704_v41 = vpop.permute.xlu1 %1703 }
 0xc97   :  { %v1706_v44 = vunpack.i.h.bf16 %v1704_v41  ;;  %v1705_v45 = vunpack.i.l.bf16 %v1704_v41 }
 0xc99   :  { %v1124_v56 = vsel %vm507_vm1, %v1122_v47, %v1706_v44  ;;  %v1123_v57 = vsel %vm507_vm1, %v1121_v6, %v1705_v45  ;;  %v1216_v44 = vperm.slane %v2155_v14, 2 }
 0xc9e   :  { %v1709_v46 = vpop.permute.xlu0 %1708 }
 0xc9f   :  { %v1711_v49 = vunpack.i.h.bf16 %v1709_v46  ;;  %v1710_v53 = vunpack.i.l.bf16 %v1709_v46 }
 0xca1   :  { %v1126_v51 = vsel %vm510_vm5, %v1124_v56, %v1711_v49  ;;  %v1125_v50 = vsel %vm510_vm5, %v1123_v57, %v1710_v53  ;;  %v1635_v49 = vld [vmem:[%s2221_s6 + $0x28] sm:$0xff]  ;;  %v1634_v53 = vld [vmem:[%s2221_s6 + $0x20] sm:$0xff]  ;;  %v1225_v57 = vperm.slane %v2155_v14, 3 }
 0xca2   :  { %v1127_v58 = vpack.c.bf16 %v1126_v51, %v1125_v50  ;;  %1301 = vmatpush.bf16.msra.mxu1 %v1635_v49 }
 0xca4   :  { %1566 = vmatmul.msk.bf16.vlgmr.msrb.gmra.mxu2 %vm150_vm3, %v1127_v58 }
 0xca6   :  { %1302 = vmatpush.bf16.msra.mxu1 %v1634_v53 }
 0xd27   :  { %v1158_v61 = vpop.f32.mrf.mxu2 }
 0xd28   :  { %v1159_v62 = vadd.f32 %v1158_v61, %v1133_v60 }
 0xd2a   :  { %v1163_v59 = vadd.f32 %v1159_v62, %v2063_v48 }
 0xd2c   :  { %v1165_v63 = vsel %vm150_vm3, %v1163_v59, 0.0  ;;  %v1171_v55 = vmul.f32 %v1163_v59, %v1163_v59 }
 0xd2d   :  { %1166 = vadd.xlane.f32.xlu2 %v1165_v63 }
 0xd2e   :  { %v1173_v1 = vsel %vm150_vm3, %v1171_v55, 0.0 }
 0xd2f   :  { %v1160_v23 = vpop.f32.mrf.mxu2  ;;  %1174 = vadd.xlane.f32.xlu1 %v1173_v1 }
 0xd30   :  { %v1161_v20 = vadd.f32 %v1160_v23, %v1133_v60 }
 0xd32   :  { %v1164_v2 = vadd.f32 %v1161_v20, %v2065_v52  ;;  %v1632_v52 = vld [vmem:[%s2220_s5 + $0x10] sm:$0xff] }
 0xd33   :  { %1248 = vmatpush.bf16.msrb.mxu3 %v1632_v52 }
 0xd34   :  { %v1168_v3 = vsel %vm150_vm3, %v1164_v2, 0.0  ;;  %v1172_v4 = vmul.f32 %v1164_v2, %v1164_v2 }
 0xd35   :  { %1169 = vadd.xlane.f32.xlu0 %v1168_v3 }
 0xd36   :  { %v1176_v5 = vsel %vm150_vm3, %v1172_v4, 0.0 }
 0xd37   :  { %1177 = vadd.xlane.f32.xlu2 %v1176_v5 }
 0xda0   :  { %v1167_v8 = vpop.xlane.xlu2 %1166 }
 0xda1   :  { %v1179_v48 = vmul.f32 0.03125, %v1167_v8 }
 0xda2   :  { %v1175_v21 = vpop.xlane.xlu1 %1174 }
 0xda3   :  { %v1183_v10 = vmul.f32 %v1179_v48, %v1179_v48  ;;  %v1181_v7 = vmul.f32 0.03125, %v1175_v21  ;;  %v1187_v36 = vsub.f32 %v1163_v59, %v1179_v48  ;;  %v1267_v59 = vperm.slane %v2155_v14, 4 }
 0xda5   :  { %v1185_v29 = vsub.f32 %v1181_v7, %v1183_v10 }
 0xda7   :  { %v1189_v12 = vadd.f32 1e-05, %v1185_v29 }
 0xda8   :  { %v1170_v16 = vpop.xlane.xlu0 %1169 }
 0xda9   :  { %1784 = vrsqrt.f32 %v1189_v12  ;;  %v1180_v17 = vmul.f32 0.03125, %v1170_v16  ;;  %vm1197_vm1 = vweird.f32 %v1189_v12 }
 0xdaa   :  { %v1178_v18 = vpop.xlane.xlu2 %1177 }
 0xdab   :  { %v1184_v19 = vmul.f32 %v1180_v17, %v1180_v17  ;;  %v1182_v22 = vmul.f32 0.03125, %v1178_v18  ;;  %v1188_v40 = vsub.f32 %v1164_v2, %v1180_v17 }
 0xdad   :  { %v1186_v26 = vsub.f32 %v1182_v22, %v1184_v19 }
 0xdaf   :  { %v1785_v28 = vpop.eup %1784  ;;  %v1190_v0 = vadd.f32 1e-05, %v1186_v26 }
 0xdb0   :  { %v1192_v30 = vmul.f32 %v1785_v28, %v1189_v12  ;;  %vm1198_vm4 = vweird.f32 %v1785_v28 }
 0xdb1   :  { %1786 = vrsqrt.f32 %v1190_v0  ;;  %vm1199_vm5 = vmor %vm1197_vm1, %vm1198_vm4  ;;  %vm1207_vm8 = vweird.f32 %v1190_v0 }
 0xdb2   :  { %v1193_v54 = vmul.f32 %v1785_v28, %v1192_v30 }
 0xdb4   :  { %v1194_v32 = vmul.f32 0.5, %v1193_v54 }
 0xdb6   :  { %v1195_v31 = vsub.f32 1.5, %v1194_v32 }
 0xdb7   :  { %v1787_v13 = vpop.eup %1786 }
 0xdb8   :  { %v1196_v34 = vmul.f32 %v1785_v28, %v1195_v31  ;;  %v1202_v15 = vmul.f32 %v1787_v13, %v1190_v0  ;;  %vm1208_vm7 = vweird.f32 %v1787_v13 }
 0xdb9   :  { %vm1209_vm9 = vmor %vm1207_vm8, %vm1208_vm7 }
 0xdba   :  { %v1203_v24 = vmul.f32 %v1787_v13, %v1202_v15  ;;  %v1200_v9 = vsel %vm1199_vm5, %v1785_v28, %v1196_v34 }
 0xdbb   :  { %v1211_v33 = vmul.f32 %v1200_v9, %v1187_v36 }
 0xdbc   :  { %v1204_v35 = vmul.f32 0.5, %v1203_v24  ;;  %v1359_v24 = vperm.slane %v2155_v14, 5 }
 0xdbd   :  { %v1214_v42 = vmul.f32 %v1213_v38, %v1211_v33 }
 0xdbe   :  { %v1205_v37 = vsub.f32 1.5, %v1204_v35 }
 0xdbf   :  { %v1217_v46 = vadd.f32 %v1216_v44, %v1214_v42 }
 0xdc0   :  { %v1206_v39 = vmul.f32 %v1787_v13, %v1205_v37  ;;  %v1362_v37 = vperm.slane %v2155_v14, 6 }
 0xdc2   :  { %v1210_v41 = vsel %vm1209_vm9, %v1787_v13, %v1206_v39 }
 0xdc3   :  { %v1212_v43 = vmul.f32 %v1210_v41, %v1188_v40 }
 0xdc5   :  { %v1215_v45 = vmul.f32 %v1213_v38, %v1212_v43 }
 0xdc7   :  { %v1218_v47 = vadd.f32 %v1216_v44, %v1215_v45 }
 0xdc9   :  { %v1219_v6 = vpack.c.bf16 %v1218_v47, %v1217_v46 }
 0xdcb   :  { %1579 = vmatmul.msk.bf16.vlgmr.msrb.gmra.mxu3 %vm150_vm3, %v1219_v6 }
 0xe4e   :  { %v1250_v56 = vpop.f32.mrf.mxu3 }
 0xe4f   :  { %v1251_v51 = vadd.f32 %v1250_v56, %v1225_v57 }
 0xe51   :  { %v1255_v60 = vmax.f32 %v1251_v51, 0.0 }
 0xe56   :  { %v1252_v50 = vpop.f32.mrf.mxu3 }
 0xe57   :  { %v1253_v58 = vadd.f32 %v1252_v50, %v1225_v57 }
 0xe59   :  { %v1256_v61 = vmax.f32 %v1253_v58, 0.0 }
 0xe5b   :  { %v1257_v62 = vpack.c.bf16 %v1256_v61, %v1255_v60  ;;  %v1639_v61 = vld [vmem:[%s2222_s7 + $0x8] sm:$0xff] }
 0xe5c   :  { %1447 = vmatpush.bf16.msra.mxu0 %v1639_v61 }
 0xe5d   :  { %1604 = vmatmul.msk.bf16.vlgmr.msra.gmra.mxu1 %vm85_vm2, %v1257_v62 }
 0xeda   :  { %v1304_v63 = vpop.f32.mrf.mxu1 }
 0xedb   :  { %v1305_v55 = vadd.f32 %v1304_v63, %v1267_v59 }
 0xedd   :  { %v1309_v1 = vadd.f32 %v1305_v55, %v1217_v46 }
 0xedf   :  { %v1311_v23 = vsel %vm150_vm3, %v1309_v1, 0.0  ;;  %v1317_v20 = vmul.f32 %v1309_v1, %v1309_v1 }
 0xee0   :  { %1312 = vadd.xlane.f32.xlu0 %v1311_v23 }
 0xee1   :  { %v1319_v2 = vsel %vm150_vm3, %v1317_v20, 0.0 }
 0xee2   :  { %v1306_v3 = vpop.f32.mrf.mxu1  ;;  %1320 = vadd.xlane.f32.xlu2 %v1319_v2 }
 0xee3   :  { %v1307_v4 = vadd.f32 %v1306_v3, %v1267_v59  ;;  %v1638_v59 = vld [vmem:[%s2222_s7] sm:$0xff] }
 0xee4   :  { %1448 = vmatpush.bf16.msra.mxu0 %v1638_v59 }
 0xee5   :  { %v1310_v5 = vadd.f32 %v1307_v4, %v1218_v47 }
 0xee7   :  { %v1314_v8 = vsel %vm150_vm3, %v1310_v5, 0.0  ;;  %v1318_v48 = vmul.f32 %v1310_v5, %v1310_v5 }
 0xee8   :  { %1315 = vadd.xlane.f32.xlu1 %v1314_v8 }
 0xee9   :  { %v1322_v21 = vsel %vm150_vm3, %v1318_v48, 0.0 }
 0xeea   :  { %1323 = vadd.xlane.f32.xlu0 %v1322_v21 }
 0xf53   :  { %v1313_v10 = vpop.xlane.xlu0 %1312 }
 0xf54   :  { %v1325_v7 = vmul.f32 0.03125, %v1313_v10 }
 0xf55   :  { %v1321_v11 = vpop.xlane.xlu2 %1320 }
 0xf56   :  { %v1329_v29 = vmul.f32 %v1325_v7, %v1325_v7  ;;  %v1327_v52 = vmul.f32 0.03125, %v1321_v11  ;;  %v1333_v15 = vsub.f32 %v1309_v1, %v1325_v7 }
 0xf58   :  { %v1331_v12 = vsub.f32 %v1327_v52, %v1329_v29 }
 0xf5a   :  { %v1335_v16 = vadd.f32 1e-05, %v1331_v12  ;;  %v1365_v12 = vld [vmem:[%s2223_s9] sm:$0xff] }
 0xf5b   :  { %v1316_v17 = vpop.xlane.xlu1 %1315 }
 0xf5c   :  { %1788 = vrsqrt.f32 %v1335_v16  ;;  %v1326_v18 = vmul.f32 0.03125, %v1316_v17  ;;  %vm1343_vm10 = vweird.f32 %v1335_v16 }
 0xf5d   :  { %v1324_v19 = vpop.xlane.xlu0 %1323 }
 0xf5e   :  { %v1330_v22 = vmul.f32 %v1326_v18, %v1326_v18  ;;  %v1328_v25 = vmul.f32 0.03125, %v1324_v19  ;;  %v1334_v42 = vsub.f32 %v1310_v5, %v1326_v18 }
 0xf60   :  { %v1332_v26 = vsub.f32 %v1328_v25, %v1330_v22  ;;  %v1414_v22 = vperm.slane %v1365_v12, 0 }
 0xf62   :  { %v1789_v27 = vpop.eup %1788  ;;  %v1336_v28 = vadd.f32 1e-05, %v1332_v26 }
 0xf63   :  { %v1338_v0 = vmul.f32 %v1789_v27, %v1335_v16  ;;  %vm1344_vm2 = vweird.f32 %v1789_v27 }
 0xf64   :  { %1790 = vrsqrt.f32 %v1336_v28  ;;  %vm1345_vm11 = vmor %vm1343_vm10, %vm1344_vm2  ;;  %vm1353_vm13 = vweird.f32 %v1336_v28 }
 0xf65   :  { %v1339_v30 = vmul.f32 %v1789_v27, %v1338_v0 }
 0xf67   :  { %v1340_v54 = vmul.f32 0.5, %v1339_v30 }
 0xf69   :  { %v1341_v32 = vsub.f32 1.5, %v1340_v54  ;;  %v1417_v54 = vperm.slane %v1365_v12, 1 }
 0xf6a   :  { %v1791_v31 = vpop.eup %1790 }
 0xf6b   :  { %v1342_v13 = vmul.f32 %v1789_v27, %v1341_v32  ;;  %v1348_v34 = vmul.f32 %v1791_v31, %v1336_v28  ;;  %vm1354_vm12 = vweird.f32 %v1791_v31 }
 0xf6c   :  { %vm1355_vm14 = vmor %vm1353_vm13, %vm1354_vm12 }
 0xf6d   :  { %v1349_v9 = vmul.f32 %v1791_v31, %v1348_v34  ;;  %v1346_v35 = vsel %vm1345_vm11, %v1789_v27, %v1342_v13 }
 0xf6e   :  { %v1357_v36 = vmul.f32 %v1346_v35, %v1333_v15  ;;  %v1425_v15 = vperm.slane %v1365_v12, 2 }
 0xf6f   :  { %v1350_v38 = vmul.f32 0.5, %v1349_v9 }
 0xf70   :  { %v1360_v33 = vmul.f32 %v1359_v24, %v1357_v36 }
 0xf71   :  { %v1351_v39 = vsub.f32 1.5, %v1350_v38 }
 0xf72   :  { %v1363_v40 = vadd.f32 %v1362_v37, %v1360_v33 }
 0xf73   :  { %v1352_v41 = vmul.f32 %v1791_v31, %v1351_v39 }
 0xf74   :  { %v1366_v43 = vsel %vm150_vm3, %v1363_v40, 0.0  ;;  %v1372_v44 = vmul.f32 %v1363_v40, %v1363_v40 }
 0xf75   :  { %1367 = vadd.xlane.f32.xlu1 %v1366_v43  ;;  %v1356_v45 = vsel %vm1355_vm14, %v1791_v31, %v1352_v41 }
 0xf76   :  { %v1374_v46 = vsel %vm150_vm3, %v1372_v44, 0.0  ;;  %v1358_v47 = vmul.f32 %v1356_v45, %v1334_v42 }
 0xf77   :  { %1375 = vadd.xlane.f32.xlu0 %v1374_v46 }
 0xf78   :  { %v1361_v6 = vmul.f32 %v1359_v24, %v1358_v47 }
 0xf7a   :  { %v1364_v14 = vadd.f32 %v1362_v37, %v1361_v6 }
 0xf7c   :  { %v1369_v49 = vsel %vm150_vm3, %v1364_v14, 0.0  ;;  %v1373_v53 = vmul.f32 %v1364_v14, %v1364_v14 }
 0xf7d   :  { %1370 = vadd.xlane.f32.xlu2 %v1369_v49 }
 0xf7e   :  { %v1377_v56 = vsel %vm150_vm3, %v1373_v53, 0.0 }
 0xf7f   :  { %1378 = vadd.xlane.f32.xlu1 %v1377_v56 }
 0xfe8   :  { %v1368_v57 = vpop.xlane.xlu1 %1367 }
 0xfe9   :  { %v1380_v51 = vmul.f32 0.03125, %v1368_v57 }
 0xfea   :  { %v1376_v50 = vpop.xlane.xlu0 %1375 }
 0xfeb   :  { %v1384_v58 = vmul.f32 %v1380_v51, %v1380_v51  ;;  %v1382_v60 = vmul.f32 0.03125, %v1376_v50  ;;  %v1388_v18 = vsub.f32 %v1363_v40, %v1380_v51 }
 0xfed   :  { %v1386_v62 = vsub.f32 %v1382_v60, %v1384_v58 }
 0xfef   :  { %v1390_v63 = vadd.f32 1e-05, %v1386_v62 }
 0xff0   :  { %v1371_v55 = vpop.xlane.xlu2 %1370 }
 0xff1   :  { %1792 = vrsqrt.f32 %v1390_v63  ;;  %v1381_v1 = vmul.f32 0.03125, %v1371_v55  ;;  %vm1398_vm0 = vweird.f32 %v1390_v63 }
 0xff2   :  { %v1379_v23 = vpop.xlane.xlu1 %1378 }
 0xff3   :  { %v1385_v20 = vmul.f32 %v1381_v1, %v1381_v1  ;;  %v1383_v2 = vmul.f32 0.03125, %v1379_v23  ;;  %v1389_v27 = vsub.f32 %v1364_v14, %v1381_v1 }
 0xff5   :  { %v1387_v3 = vsub.f32 %v1383_v2, %v1385_v20 }
 0xff7   :  { %v1793_v4 = vpop.eup %1792  ;;  %v1391_v5 = vadd.f32 1e-05, %v1387_v3 }
 0xff8   :  { %v1393_v8 = vmul.f32 %v1793_v4, %v1390_v63  ;;  %vm1399_vm15 = vweird.f32 %v1793_v4 }
 0xff9   :  { %1794 = vrsqrt.f32 %v1391_v5  ;;  %vm1400_vm6 = vmor %vm1398_vm0, %vm1399_vm15  ;;  %vm1408_vm1 = vweird.f32 %v1391_v5 }
 0xffa   :  { %v1394_v48 = vmul.f32 %v1793_v4, %v1393_v8 }
 0xffc   :  { %v1395_v21 = vmul.f32 0.5, %v1394_v48 }
 0xffe   :  { %v1396_v10 = vsub.f32 1.5, %v1395_v21 }
 0xfff   :  { %v1795_v7 = vpop.eup %1794 }
0x1000   :  { %v1397_v11 = vmul.f32 %v1793_v4, %v1396_v10  ;;  %v1403_v29 = vmul.f32 %v1795_v7, %v1391_v5  ;;  %vm1409_vm4 = vweird.f32 %v1795_v7 }
0x1001   :  { %vm1410_vm5 = vmor %vm1408_vm1, %vm1409_vm4 }
0x1002   :  { %v1404_v52 = vmul.f32 %v1795_v7, %v1403_v29  ;;  %v1401_v16 = vsel %vm1400_vm6, %v1793_v4, %v1397_v11 }
0x1003   :  { %v1412_v25 = vmul.f32 %v1401_v16, %v1388_v18 }
0x1004   :  { %v1405_v17 = vmul.f32 0.5, %v1404_v52 }
0x1005   :  { %v1415_v0 = vmul.f32 %v1414_v22, %v1412_v25 }
0x1006   :  { %v1406_v19 = vsub.f32 1.5, %v1405_v17 }
0x1007   :  { %v1418_v31 = vadd.f32 %v1417_v54, %v1415_v0 }
0x1008   :  { %v1407_v26 = vmul.f32 %v1795_v7, %v1406_v19 }
0x100a   :  { %v1411_v28 = vsel %vm1410_vm5, %v1795_v7, %v1407_v26 }
0x100b   :  { %v1413_v30 = vmul.f32 %v1411_v28, %v1389_v27 }
0x100d   :  { %v1416_v32 = vmul.f32 %v1414_v22, %v1413_v30 }
0x100f   :  { %v1419_v13 = vadd.f32 %v1417_v54, %v1416_v32 }
0x1011   :  { %v1420_v34 = vpack.c.bf16 %v1419_v13, %v1418_v31 }
0x1013   :  { %1613 = vmatmul.msk.bf16.vlgmr.msra.gmra.mxu0 %vm150_vm3, %v1420_v34 }
0x1090   :  { %v1450_v24 = vpop.f32.mrf.mxu0 }
0x1091   :  { %v1451_v9 = vadd.f32 %v1450_v24, %v1425_v15 }
0x1093   :  { %1455 = vst [vmem:[%s2224_s10] sm:$0xff] %v1451_v9 }
0x1098   :  { %v1452_v35 = vpop.f32.mrf.mxu0 }
0x1099   :  { %v1453_v36 = vadd.f32 %v1452_v35, %v1425_v15 }
0x109b   :  { %1456 = vst [vmem:[%s2224_s10 + $0x8] sm:$0xff] %v1453_v36 }

</bundles_post_ra>
